<compile_context>
chip_gen: v5e
topology: v5e:2x2
jax: 0.10.0
libtpu: 0.0.40
codegen_flags: <defaults>
</compile_context>

<pallas_src>
import functools

import jax
import jax.numpy as jnp
from jax.experimental import pallas as pl
from jax.experimental.pallas import tpu as pltpu


# ----------------------------- config (small, synthetic) --------------------
VOCAB = 100
VOCAB_PAD = 128           # word-embedding table zero-padded to 128 rows (one-hot matmul)
HIDDEN = 32
NUM_HEADS = 4
HEAD_DIM = HIDDEN // NUM_HEADS
INTERMEDIATE = 64
NUM_LAYERS = 2
MAX_POS = 16
TYPE_VOCAB = 2
NUM_LABELS = 1
PAD_LABELS = 128          # lane-dense classifier output; real logits sliced outside
LN_EPS = 1e-12

BATCH = 2
SEQ = 8


# ----------------------------- in-kernel helpers -----------------------------
def _ln(y, g, b, eps):
    mean = jnp.mean(y, axis=-1, keepdims=True)
    var = jnp.mean((y - mean) ** 2, axis=-1, keepdims=True)
    return (y - mean) * jax.lax.rsqrt(var + eps) * g + b


def _gelu(y):
    # TODO(synk): HF BERT uses exact erf-GELU; tanh approximation used here.
    return 0.5 * y * (1.0 + jnp.tanh(0.7978845608028654 * (y + 0.044715 * y * y * y)))


# ----------------------------- fused forward kernel --------------------------
def _bert_fused_kernel(ids_ref, bias_ref, wemb_ref, pe_ref, te_ref,
                       eln_g_ref, eln_b_ref,
                       wqkv_ref, bqkv_ref, ao_w_ref, ao_b_ref, ln1_g_ref, ln1_b_ref,
                       i_w_ref, i_b_ref, o_w_ref, o_b_ref, ln2_g_ref, ln2_b_ref,
                       cls_w_ref, cls_b_ref,
                       o_ref, ctx_ref, *,
                       batch, seq, num_layers, num_heads, head_dim, scale, eps):
    bs = batch * seq
    hidden = num_heads * head_dim
    f32 = jnp.float32

    # --- embeddings: word gather as one-hot MXU matmul, + pos + type, LayerNorm ---
    ids = ids_ref[...]                                                    # (BS, 1) i32
    onehot = (jax.lax.broadcasted_iota(jnp.int32, (bs, wemb_ref.shape[0]), 1)
              == ids).astype(f32)                                         # (BS, VOCAB_PAD)
    we = jnp.dot(onehot, wemb_ref[...], preferred_element_type=f32)       # (BS, H)
    pe = jnp.concatenate([pe_ref[:seq, :]] * batch, axis=0)               # (BS, H)
    x = _ln(we + pe + te_ref[...], eln_g_ref[...], eln_b_ref[...], eps)   # (BS, H)

    bias = bias_ref[...]                                                  # (BS, BS) 0/-1e9

    # --- encoder layers: statically unrolled; activations never leave VMEM ---
    for l in range(num_layers):
        # fused QKV projection: one MXU pass, 3H-lane-wide output
        qkv = jnp.dot(x, wqkv_ref[l], preferred_element_type=f32) + bqkv_ref[l]

        # per-head attention over ALL batches at once (block-diagonal bias)
        for h in range(num_heads):
            lo = h * head_dim
            qh = qkv[:, lo:lo + head_dim]                                 # (BS, Dh)
            kh = qkv[:, hidden + lo:hidden + lo + head_dim]               # (BS, Dh)
            vh = qkv[:, 2 * hidden + lo:2 * hidden + lo + head_dim]       # (BS, Dh)
            s = jnp.einsum("qd,kd->qk", qh, kh,
                           preferred_element_type=f32) * scale + bias     # (BS, BS)
            s = s - jnp.max(s, axis=-1, keepdims=True)
            p = jnp.exp(s)
            p = p / jnp.sum(p, axis=-1, keepdims=True)
            ctx_ref[:, lo:lo + head_dim] = jnp.dot(p, vh, preferred_element_type=f32)

        # attention output proj + residual + LayerNorm
        attn = jnp.dot(ctx_ref[...], ao_w_ref[l],
                       preferred_element_type=f32) + ao_b_ref[l]
        x = _ln(attn + x, ln1_g_ref[l], ln1_b_ref[l], eps)

        # FFN (GELU) + residual + LayerNorm
        inter = _gelu(jnp.dot(x, i_w_ref[l],
                              preferred_element_type=f32) + i_b_ref[l])
        ffn = jnp.dot(inter, o_w_ref[l], preferred_element_type=f32) + o_b_ref[l]
        x = _ln(ffn + x, ln2_g_ref[l], ln2_b_ref[l], eps)

    # --- classification head on the [CLS] row of each batch (Dropout = no-op) ---
    cls = jnp.concatenate([x[b * seq:b * seq + 1, :] for b in range(batch)], axis=0)
    o_ref[...] = (jnp.dot(cls, cls_w_ref[...], preferred_element_type=f32)
                  + cls_b_ref[...]).astype(o_ref.dtype)


# ----------------------------- parameter init -------------------------------
def init_params(key):
    ks = iter(jax.random.split(key, 8 + NUM_LAYERS * 8))

    def w(shape, k):
        return jax.random.normal(k, shape, jnp.float32) * 0.02

    word_emb = w((VOCAB, HIDDEN), next(ks))
    word_emb_pad = jnp.zeros((VOCAB_PAD, HIDDEN), jnp.float32).at[:VOCAB].set(word_emb)
    cls_w = w((HIDDEN, NUM_LABELS), next(ks))
    cls_w_pad = jnp.zeros((HIDDEN, PAD_LABELS), jnp.float32).at[:, :NUM_LABELS].set(cls_w)

    layer_keys = ("wqkv", "bqkv", "ao_w", "ao_b", "ln1_g", "ln1_b",
                  "i_w", "i_b", "o_w", "o_b", "ln2_g", "ln2_b")
    layers = {k: [] for k in layer_keys}
    for _ in range(NUM_LAYERS):
        layers["wqkv"].append(w((HIDDEN, 3 * HIDDEN), next(ks)))
        layers["bqkv"].append(jnp.zeros((1, 3 * HIDDEN), jnp.float32))
        layers["ao_w"].append(w((HIDDEN, HIDDEN), next(ks)))
        layers["ao_b"].append(jnp.zeros((1, HIDDEN), jnp.float32))
        layers["ln1_g"].append(jnp.ones((1, HIDDEN), jnp.float32))
        layers["ln1_b"].append(jnp.zeros((1, HIDDEN), jnp.float32))
        layers["i_w"].append(w((HIDDEN, INTERMEDIATE), next(ks)))
        layers["i_b"].append(jnp.zeros((1, INTERMEDIATE), jnp.float32))
        layers["o_w"].append(w((INTERMEDIATE, HIDDEN), next(ks)))
        layers["o_b"].append(jnp.zeros((1, HIDDEN), jnp.float32))
        layers["ln2_g"].append(jnp.ones((1, HIDDEN), jnp.float32))
        layers["ln2_b"].append(jnp.zeros((1, HIDDEN), jnp.float32))

    params = {
        "word_emb_pad": word_emb_pad,
        "pos_emb": w((MAX_POS, HIDDEN), next(ks)),
        # TODO(synk): token_type_ids fixed to segment 0; only type_emb[0] is added.
        "type_emb0": w((TYPE_VOCAB, HIDDEN), next(ks))[0:1, :],
        "emb_ln_g": jnp.ones((1, HIDDEN), jnp.float32),
        "emb_ln_b": jnp.zeros((1, HIDDEN), jnp.float32),
        "cls_w_pad": cls_w_pad,
        "cls_b_pad": jnp.zeros((1, PAD_LABELS), jnp.float32),
    }
    params.update({k: jnp.stack(v, axis=0) for k, v in layers.items()})
    return params


# ----------------------------- model forward ---------------------------------
def bert_for_classification_forward(params, input_ids, attention_mask):
    """Matches BertForClassification.forward(labels=None) -> {'logits': ...}."""
    B, S = input_ids.shape
    BS = B * S

    # Kernel inputs prepared in XLA (all tiny / constant-foldable):
    ids = input_ids.reshape(BS, 1).astype(jnp.int32)
    # block-diagonal additive bias: 0 for (same batch AND key unmasked), else -1e9
    bid = jnp.repeat(jnp.arange(B, dtype=jnp.int32), S)
    same_batch = (bid[:, None] == bid[None, :]).astype(jnp.float32)       # (BS, BS)
    key_ok = attention_mask.astype(jnp.float32).reshape(1, BS)            # (1, BS)
    attn_bias = (same_batch * key_ok - 1.0) * 1e9                         # (BS, BS)

    weight_names = ("word_emb_pad", "pos_emb", "type_emb0", "emb_ln_g", "emb_ln_b",
                    "wqkv", "bqkv", "ao_w", "ao_b", "ln1_g", "ln1_b",
                    "i_w", "i_b", "o_w", "o_b", "ln2_g", "ln2_b",
                    "cls_w_pad", "cls_b_pad")
    weights = [params[k] for k in weight_names]

    # Advisory cost estimate for the XLA scheduler.
    flops = int(2 * BS * VOCAB_PAD * HIDDEN
                + NUM_LAYERS * (2 * BS * HIDDEN * 3 * HIDDEN
                                + 4 * BS * BS * HIDDEN
                                + 2 * BS * HIDDEN * HIDDEN
                                + 4 * BS * HIDDEN * INTERMEDIATE)
                + 2 * B * HIDDEN * PAD_LABELS)
    transcendentals = int(NUM_LAYERS * (NUM_HEADS * BS * BS + BS * INTERMEDIATE))
    bytes_accessed = int(sum(int(w.size) for w in weights) * 4
                         + ids.size * 4 + attn_bias.size * 4 + B * PAD_LABELS * 4)

    kernel = functools.partial(
        _bert_fused_kernel, batch=B, seq=S, num_layers=NUM_LAYERS,
        num_heads=NUM_HEADS, head_dim=HEAD_DIM,
        scale=1.0 / (HEAD_DIM ** 0.5), eps=LN_EPS)

    logits_pad = pl.pallas_call(
        kernel,
        out_shape=jax.ShapeDtypeStruct((B, PAD_LABELS), jnp.float32),
        in_specs=[pl.BlockSpec(memory_space=pltpu.MemorySpace.VMEM)] * (2 + len(weights)),
        out_specs=pl.BlockSpec(memory_space=pltpu.MemorySpace.VMEM),
        scratch_shapes=[pltpu.VMEM((BS, HIDDEN), jnp.float32)],
        cost_estimate=pl.CostEstimate(flops=flops, transcendentals=transcendentals,
                                      bytes_accessed=bytes_accessed),
    )(ids, attn_bias, *weights)

    # TODO(synk): CrossEntropyLoss branch (labels is not None) not implemented.
    return {"logits": logits_pad[:, :NUM_LABELS]}


# ----------------------------- main ------------------------------------------
if __name__ == "__main__":
    key = jax.random.PRNGKey(0)
    k_param, k_ids = jax.random.split(key)

    params = init_params(k_param)
    input_ids = jax.random.randint(k_ids, (BATCH, SEQ), 0, VOCAB, dtype=jnp.int32)
    attention_mask = jnp.array([[1, 1, 1, 1, 1, 1, 1, 1],
                                [1, 1, 1, 1, 1, 0, 0, 0]], dtype=jnp.int32)

    fwd = jax.jit(bert_for_classification_forward)
    out = fwd(params, input_ids, attention_mask)
    logits = jax.block_until_ready(out["logits"])
    assert logits.shape == (BATCH, NUM_LABELS)
    assert bool(jnp.all(jnp.isfinite(logits)))
    print("KERNEL_OK")
</pallas_src>

<mosaic_0001>
module attributes {stable_mosaic.version = 11 : i64} {
  func.func @_bert_fused_kernel(%arg0: memref<16x1xi32, #tpu.memory_space<vmem>>, %arg1: memref<16x16xf32, #tpu.memory_space<vmem>>, %arg2: memref<128x32xf32, #tpu.memory_space<vmem>>, %arg3: memref<16x32xf32, #tpu.memory_space<vmem>>, %arg4: memref<1x32xf32, #tpu.memory_space<vmem>>, %arg5: memref<1x32xf32, #tpu.memory_space<vmem>>, %arg6: memref<1x32xf32, #tpu.memory_space<vmem>>, %arg7: memref<2x32x96xf32, #tpu.memory_space<vmem>>, %arg8: memref<2x1x96xf32, #tpu.memory_space<vmem>>, %arg9: memref<2x32x32xf32, #tpu.memory_space<vmem>>, %arg10: memref<2x1x32xf32, #tpu.memory_space<vmem>>, %arg11: memref<2x1x32xf32, #tpu.memory_space<vmem>>, %arg12: memref<2x1x32xf32, #tpu.memory_space<vmem>>, %arg13: memref<2x32x64xf32, #tpu.memory_space<vmem>>, %arg14: memref<2x1x64xf32, #tpu.memory_space<vmem>>, %arg15: memref<2x64x32xf32, #tpu.memory_space<vmem>>, %arg16: memref<2x1x32xf32, #tpu.memory_space<vmem>>, %arg17: memref<2x1x32xf32, #tpu.memory_space<vmem>>, %arg18: memref<2x1x32xf32, #tpu.memory_space<vmem>>, %arg19: memref<32x128xf32, #tpu.memory_space<vmem>>, %arg20: memref<1x128xf32, #tpu.memory_space<vmem>>, %arg21: memref<2x128xf32, #tpu.memory_space<vmem>>, %arg22: memref<16x32xf32, #tpu.memory_space<vmem>>) attributes {dimension_semantics = [], scalar_prefetch = 0 : i64, scratch_operands = 1 : i64, tpu.core_type = #tpu.core_type<tc>} {
    %c0 = arith.constant 0 : index
    %c0_0 = arith.constant 0 : index
    %0 = vector.load %arg0[%c0, %c0_0] : memref<16x1xi32, #tpu.memory_space<vmem>>, vector<16x1xi32>
    %1 = tpu.iota {dimensions = array<i32: 1>} : vector<16x128xi32>
    %2 = vector.broadcast %0 : vector<16x1xi32> to vector<16x128xi32>
    %3 = arith.cmpi eq, %1, %2 : vector<16x128xi32>
    %4 = arith.extui %3 : vector<16x128xi1> to vector<16x128xi32>
    %5 = arith.sitofp %4 : vector<16x128xi32> to vector<16x128xf32>
    %c0_1 = arith.constant 0 : index
    %c0_2 = arith.constant 0 : index
    %6 = vector.load %arg2[%c0_1, %c0_2] : memref<128x32xf32, #tpu.memory_space<vmem>>, vector<128x32xf32>
    %cst = arith.constant dense<0.000000e+00> : vector<16x32xf32>
    %7 = tpu.matmul %5, %6, %cst {dimension_numbers = #tpu.dot_dimension_numbers<[1], [0], [0], [1], [0, 0, 1, 1], [], []>} : vector<16x128xf32>, vector<128x32xf32>, vector<16x32xf32> -> vector<16x32xf32>
    %c0_3 = arith.constant 0 : index
    %c0_4 = arith.constant 0 : index
    %8 = vector.load %arg3[%c0_3, %c0_4] : memref<16x32xf32, #tpu.memory_space<vmem>>, vector<8x32xf32>
    %9 = tpu.concatenate %8, %8 in 0 : vector<8x32xf32>, vector<8x32xf32> -> vector<16x32xf32>
    %10 = arith.addf %7, %9 : vector<16x32xf32>
    %c0_5 = arith.constant 0 : index
    %c0_6 = arith.constant 0 : index
    %11 = vector.load %arg4[%c0_5, %c0_6] : memref<1x32xf32, #tpu.memory_space<vmem>>, vector<1x32xf32>
    %12 = vector.broadcast %11 : vector<1x32xf32> to vector<16x32xf32>
    %13 = arith.addf %10, %12 : vector<16x32xf32>
    %c0_7 = arith.constant 0 : index
    %c0_8 = arith.constant 0 : index
    %14 = vector.load %arg5[%c0_7, %c0_8] : memref<1x32xf32, #tpu.memory_space<vmem>>, vector<1x32xf32>
    %c0_9 = arith.constant 0 : index
    %c0_10 = arith.constant 0 : index
    %15 = vector.load %arg6[%c0_9, %c0_10] : memref<1x32xf32, #tpu.memory_space<vmem>>, vector<1x32xf32>
    %cst_11 = arith.constant dense<0.000000e+00> : vector<16xf32>
    %16 = vector.multi_reduction <add>, %13, %cst_11 [1] : vector<16x32xf32> to vector<16xf32>
    %17 = vector.shape_cast %16 : vector<16xf32> to vector<16x1xf32>
    %cst_12 = arith.constant 3.200000e+01 : f32
    %18 = vector.broadcast %cst_12 : f32 to vector<16x1xf32>
    %19 = arith.divf %17, %18 : vector<16x1xf32>
    %20 = vector.broadcast %19 : vector<16x1xf32> to vector<16x32xf32>
    %21 = arith.subf %13, %20 : vector<16x32xf32>
    %22 = arith.mulf %21, %21 : vector<16x32xf32>
    %cst_13 = arith.constant dense<0.000000e+00> : vector<16xf32>
    %23 = vector.multi_reduction <add>, %22, %cst_13 [1] : vector<16x32xf32> to vector<16xf32>
    %24 = vector.shape_cast %23 : vector<16xf32> to vector<16x1xf32>
    %cst_14 = arith.constant 3.200000e+01 : f32
    %25 = vector.broadcast %cst_14 : f32 to vector<16x1xf32>
    %26 = arith.divf %24, %25 : vector<16x1xf32>
    %27 = vector.broadcast %19 : vector<16x1xf32> to vector<16x32xf32>
    %28 = arith.subf %13, %27 : vector<16x32xf32>
    %cst_15 = arith.constant 9.99999996E-13 : f32
    %29 = vector.broadcast %cst_15 : f32 to vector<16x1xf32>
    %30 = arith.addf %26, %29 : vector<16x1xf32>
    %31 = math.rsqrt %30 : vector<16x1xf32>
    %32 = vector.broadcast %31 : vector<16x1xf32> to vector<16x32xf32>
    %33 = arith.mulf %28, %32 : vector<16x32xf32>
    %34 = vector.broadcast %14 : vector<1x32xf32> to vector<16x32xf32>
    %35 = arith.mulf %33, %34 : vector<16x32xf32>
    %36 = vector.broadcast %15 : vector<1x32xf32> to vector<16x32xf32>
    %37 = arith.addf %35, %36 : vector<16x32xf32>
    %c0_16 = arith.constant 0 : index
    %c0_17 = arith.constant 0 : index
    %38 = vector.load %arg1[%c0_16, %c0_17] : memref<16x16xf32, #tpu.memory_space<vmem>>, vector<16x16xf32>
    %c0_18 = arith.constant 0 : index
    %c0_19 = arith.constant 0 : index
    %c0_20 = arith.constant 0 : index
    %39 = vector.load %arg7[%c0_18, %c0_19, %c0_20] : memref<2x32x96xf32, #tpu.memory_space<vmem>>, vector<1x32x96xf32>
    %40 = vector.shape_cast %39 : vector<1x32x96xf32> to vector<32x96xf32>
    %cst_21 = arith.constant dense<0.000000e+00> : vector<16x96xf32>
    %41 = tpu.matmul %37, %40, %cst_21 {dimension_numbers = #tpu.dot_dimension_numbers<[1], [0], [0], [1], [0, 0, 1, 1], [], []>} : vector<16x32xf32>, vector<32x96xf32>, vector<16x96xf32> -> vector<16x96xf32>
    %c0_22 = arith.constant 0 : index
    %c0_23 = arith.constant 0 : index
    %c0_24 = arith.constant 0 : index
    %42 = vector.load %arg8[%c0_22, %c0_23, %c0_24] : memref<2x1x96xf32, #tpu.memory_space<vmem>>, vector<1x1x96xf32>
    %43 = vector.shape_cast %42 : vector<1x1x96xf32> to vector<1x96xf32>
    %44 = vector.broadcast %43 : vector<1x96xf32> to vector<16x96xf32>
    %45 = arith.addf %41, %44 : vector<16x96xf32>
    %46 = vector.extract_strided_slice %45 {offsets = [0, 0], sizes = [16, 8], strides = [1, 1]} : vector<16x96xf32> to vector<16x8xf32>
    %47 = vector.extract_strided_slice %45 {offsets = [0, 32], sizes = [16, 8], strides = [1, 1]} : vector<16x96xf32> to vector<16x8xf32>
    %48 = vector.extract_strided_slice %45 {offsets = [0, 64], sizes = [16, 8], strides = [1, 1]} : vector<16x96xf32> to vector<16x8xf32>
    "tpu.trace_start"() <{level = 10 : i32, message = "qd,kd->qk"}> : () -> ()
    %cst_25 = arith.constant dense<0.000000e+00> : vector<16x16xf32>
    %49 = tpu.matmul %46, %47, %cst_25 {dimension_numbers = #tpu.dot_dimension_numbers<[1], [1], [0], [0], [0, 0, 1, 0], [], []>} : vector<16x8xf32>, vector<16x8xf32>, vector<16x16xf32> -> vector<16x16xf32>
    "tpu.trace_stop"() : () -> ()
    %cst_26 = arith.constant 0.353553385 : f32
    %50 = vector.broadcast %cst_26 : f32 to vector<16x16xf32>
    %51 = arith.mulf %49, %50 : vector<16x16xf32>
    %52 = arith.addf %51, %38 : vector<16x16xf32>
    %cst_27 = arith.constant dense<0xFF800000> : vector<16xf32>
    %53 = vector.multi_reduction <maximumf>, %52, %cst_27 [1] : vector<16x16xf32> to vector<16xf32>
    %54 = vector.shape_cast %53 : vector<16xf32> to vector<16x1xf32>
    %55 = vector.broadcast %54 : vector<16x1xf32> to vector<16x16xf32>
    %56 = arith.subf %52, %55 : vector<16x16xf32>
    %57 = math.exp %56 : vector<16x16xf32>
    %cst_28 = arith.constant dense<0.000000e+00> : vector<16xf32>
    %58 = vector.multi_reduction <add>, %57, %cst_28 [1] : vector<16x16xf32> to vector<16xf32>
    %59 = vector.shape_cast %58 : vector<16xf32> to vector<16x1xf32>
    %60 = vector.broadcast %59 : vector<16x1xf32> to vector<16x16xf32>
    %61 = arith.divf %57, %60 : vector<16x16xf32>
    %cst_29 = arith.constant dense<0.000000e+00> : vector<16x8xf32>
    %62 = tpu.matmul %61, %48, %cst_29 {dimension_numbers = #tpu.dot_dimension_numbers<[1], [0], [0], [1], [0, 0, 1, 1], [], []>} : vector<16x16xf32>, vector<16x8xf32>, vector<16x8xf32> -> vector<16x8xf32>
    %c0_30 = arith.constant 0 : index
    %c0_31 = arith.constant 0 : index
    %63 = vector.load %arg22[%c0_30, %c0_31] : memref<16x32xf32, #tpu.memory_space<vmem>>, vector<16x8xf32>
    tpu.vector_store %arg22[%c0_30, %c0_31], %62 {strides = array<i32>} : memref<16x32xf32, #tpu.memory_space<vmem>>, vector<16x8xf32>,
    %64 = vector.extract_strided_slice %45 {offsets = [0, 8], sizes = [16, 8], strides = [1, 1]} : vector<16x96xf32> to vector<16x8xf32>
    %65 = vector.extract_strided_slice %45 {offsets = [0, 40], sizes = [16, 8], strides = [1, 1]} : vector<16x96xf32> to vector<16x8xf32>
    %66 = vector.extract_strided_slice %45 {offsets = [0, 72], sizes = [16, 8], strides = [1, 1]} : vector<16x96xf32> to vector<16x8xf32>
    "tpu.trace_start"() <{level = 10 : i32, message = "qd,kd->qk"}> : () -> ()
    %cst_32 = arith.constant dense<0.000000e+00> : vector<16x16xf32>
    %67 = tpu.matmul %64, %65, %cst_32 {dimension_numbers = #tpu.dot_dimension_numbers<[1], [1], [0], [0], [0, 0, 1, 0], [], []>} : vector<16x8xf32>, vector<16x8xf32>, vector<16x16xf32> -> vector<16x16xf32>
    "tpu.trace_stop"() : () -> ()
    %cst_33 = arith.constant 0.353553385 : f32
    %68 = vector.broadcast %cst_33 : f32 to vector<16x16xf32>
    %69 = arith.mulf %67, %68 : vector<16x16xf32>
    %70 = arith.addf %69, %38 : vector<16x16xf32>
    %cst_34 = arith.constant dense<0xFF800000> : vector<16xf32>
    %71 = vector.multi_reduction <maximumf>, %70, %cst_34 [1] : vector<16x16xf32> to vector<16xf32>
    %72 = vector.shape_cast %71 : vector<16xf32> to vector<16x1xf32>
    %73 = vector.broadcast %72 : vector<16x1xf32> to vector<16x16xf32>
    %74 = arith.subf %70, %73 : vector<16x16xf32>
    %75 = math.exp %74 : vector<16x16xf32>
    %cst_35 = arith.constant dense<0.000000e+00> : vector<16xf32>
    %76 = vector.multi_reduction <add>, %75, %cst_35 [1] : vector<16x16xf32> to vector<16xf32>
    %77 = vector.shape_cast %76 : vector<16xf32> to vector<16x1xf32>
    %78 = vector.broadcast %77 : vector<16x1xf32> to vector<16x16xf32>
    %79 = arith.divf %75, %78 : vector<16x16xf32>
    %cst_36 = arith.constant dense<0.000000e+00> : vector<16x8xf32>
    %80 = tpu.matmul %79, %66, %cst_36 {dimension_numbers = #tpu.dot_dimension_numbers<[1], [0], [0], [1], [0, 0, 1, 1], [], []>} : vector<16x16xf32>, vector<16x8xf32>, vector<16x8xf32> -> vector<16x8xf32>
    %c0_37 = arith.constant 0 : index
    %c8 = arith.constant 8 : index
    %81 = vector.load %arg22[%c0_37, %c8] : memref<16x32xf32, #tpu.memory_space<vmem>>, vector<16x8xf32>
    tpu.vector_store %arg22[%c0_37, %c8], %80 {strides = array<i32>} : memref<16x32xf32, #tpu.memory_space<vmem>>, vector<16x8xf32>,
    %82 = vector.extract_strided_slice %45 {offsets = [0, 16], sizes = [16, 8], strides = [1, 1]} : vector<16x96xf32> to vector<16x8xf32>
    %83 = vector.extract_strided_slice %45 {offsets = [0, 48], sizes = [16, 8], strides = [1, 1]} : vector<16x96xf32> to vector<16x8xf32>
    %84 = vector.extract_strided_slice %45 {offsets = [0, 80], sizes = [16, 8], strides = [1, 1]} : vector<16x96xf32> to vector<16x8xf32>
    "tpu.trace_start"() <{level = 10 : i32, message = "qd,kd->qk"}> : () -> ()
    %cst_38 = arith.constant dense<0.000000e+00> : vector<16x16xf32>
    %85 = tpu.matmul %82, %83, %cst_38 {dimension_numbers = #tpu.dot_dimension_numbers<[1], [1], [0], [0], [0, 0, 1, 0], [], []>} : vector<16x8xf32>, vector<16x8xf32>, vector<16x16xf32> -> vector<16x16xf32>
    "tpu.trace_stop"() : () -> ()
    %cst_39 = arith.constant 0.353553385 : f32
    %86 = vector.broadcast %cst_39 : f32 to vector<16x16xf32>
    %87 = arith.mulf %85, %86 : vector<16x16xf32>
    %88 = arith.addf %87, %38 : vector<16x16xf32>
    %cst_40 = arith.constant dense<0xFF800000> : vector<16xf32>
    %89 = vector.multi_reduction <maximumf>, %88, %cst_40 [1] : vector<16x16xf32> to vector<16xf32>
    %90 = vector.shape_cast %89 : vector<16xf32> to vector<16x1xf32>
    %91 = vector.broadcast %90 : vector<16x1xf32> to vector<16x16xf32>
    %92 = arith.subf %88, %91 : vector<16x16xf32>
    %93 = math.exp %92 : vector<16x16xf32>
    %cst_41 = arith.constant dense<0.000000e+00> : vector<16xf32>
    %94 = vector.multi_reduction <add>, %93, %cst_41 [1] : vector<16x16xf32> to vector<16xf32>
    %95 = vector.shape_cast %94 : vector<16xf32> to vector<16x1xf32>
    %96 = vector.broadcast %95 : vector<16x1xf32> to vector<16x16xf32>
    %97 = arith.divf %93, %96 : vector<16x16xf32>
    %cst_42 = arith.constant dense<0.000000e+00> : vector<16x8xf32>
    %98 = tpu.matmul %97, %84, %cst_42 {dimension_numbers = #tpu.dot_dimension_numbers<[1], [0], [0], [1], [0, 0, 1, 1], [], []>} : vector<16x16xf32>, vector<16x8xf32>, vector<16x8xf32> -> vector<16x8xf32>
    %c0_43 = arith.constant 0 : index
    %c16 = arith.constant 16 : index
    %99 = vector.load %arg22[%c0_43, %c16] : memref<16x32xf32, #tpu.memory_space<vmem>>, vector<16x8xf32>
    tpu.vector_store %arg22[%c0_43, %c16], %98 {strides = array<i32>} : memref<16x32xf32, #tpu.memory_space<vmem>>, vector<16x8xf32>,
    %100 = vector.extract_strided_slice %45 {offsets = [0, 24], sizes = [16, 8], strides = [1, 1]} : vector<16x96xf32> to vector<16x8xf32>
    %101 = vector.extract_strided_slice %45 {offsets = [0, 56], sizes = [16, 8], strides = [1, 1]} : vector<16x96xf32> to vector<16x8xf32>
    %102 = vector.extract_strided_slice %45 {offsets = [0, 88], sizes = [16, 8], strides = [1, 1]} : vector<16x96xf32> to vector<16x8xf32>
    "tpu.trace_start"() <{level = 10 : i32, message = "qd,kd->qk"}> : () -> ()
    %cst_44 = arith.constant dense<0.000000e+00> : vector<16x16xf32>
    %103 = tpu.matmul %100, %101, %cst_44 {dimension_numbers = #tpu.dot_dimension_numbers<[1], [1], [0], [0], [0, 0, 1, 0], [], []>} : vector<16x8xf32>, vector<16x8xf32>, vector<16x16xf32> -> vector<16x16xf32>
    "tpu.trace_stop"() : () -> ()
    %cst_45 = arith.constant 0.353553385 : f32
    %104 = vector.broadcast %cst_45 : f32 to vector<16x16xf32>
    %105 = arith.mulf %103, %104 : vector<16x16xf32>
    %106 = arith.addf %105, %38 : vector<16x16xf32>
    %cst_46 = arith.constant dense<0xFF800000> : vector<16xf32>
    %107 = vector.multi_reduction <maximumf>, %106, %cst_46 [1] : vector<16x16xf32> to vector<16xf32>
    %108 = vector.shape_cast %107 : vector<16xf32> to vector<16x1xf32>
    %109 = vector.broadcast %108 : vector<16x1xf32> to vector<16x16xf32>
    %110 = arith.subf %106, %109 : vector<16x16xf32>
    %111 = math.exp %110 : vector<16x16xf32>
    %cst_47 = arith.constant dense<0.000000e+00> : vector<16xf32>
    %112 = vector.multi_reduction <add>, %111, %cst_47 [1] : vector<16x16xf32> to vector<16xf32>
    %113 = vector.shape_cast %112 : vector<16xf32> to vector<16x1xf32>
    %114 = vector.broadcast %113 : vector<16x1xf32> to vector<16x16xf32>
    %115 = arith.divf %111, %114 : vector<16x16xf32>
    %cst_48 = arith.constant dense<0.000000e+00> : vector<16x8xf32>
    %116 = tpu.matmul %115, %102, %cst_48 {dimension_numbers = #tpu.dot_dimension_numbers<[1], [0], [0], [1], [0, 0, 1, 1], [], []>} : vector<16x16xf32>, vector<16x8xf32>, vector<16x8xf32> -> vector<16x8xf32>
    %c0_49 = arith.constant 0 : index
    %c24 = arith.constant 24 : index
    %117 = vector.load %arg22[%c0_49, %c24] : memref<16x32xf32, #tpu.memory_space<vmem>>, vector<16x8xf32>
    tpu.vector_store %arg22[%c0_49, %c24], %116 {strides = array<i32>} : memref<16x32xf32, #tpu.memory_space<vmem>>, vector<16x8xf32>,
    %c0_50 = arith.constant 0 : index
    %c0_51 = arith.constant 0 : index
    %118 = vector.load %arg22[%c0_50, %c0_51] : memref<16x32xf32, #tpu.memory_space<vmem>>, vector<16x32xf32>
    %c0_52 = arith.constant 0 : index
    %c0_53 = arith.constant 0 : index
    %c0_54 = arith.constant 0 : index
    %119 = vector.load %arg9[%c0_52, %c0_53, %c0_54] : memref<2x32x32xf32, #tpu.memory_space<vmem>>, vector<1x32x32xf32>
    %120 = vector.shape_cast %119 : vector<1x32x32xf32> to vector<32x32xf32>
    %cst_55 = arith.constant dense<0.000000e+00> : vector<16x32xf32>
    %121 = tpu.matmul %118, %120, %cst_55 {dimension_numbers = #tpu.dot_dimension_numbers<[1], [0], [0], [1], [0, 0, 1, 1], [], []>} : vector<16x32xf32>, vector<32x32xf32>, vector<16x32xf32> -> vector<16x32xf32>
    %c0_56 = arith.constant 0 : index
    %c0_57 = arith.constant 0 : index
    %c0_58 = arith.constant 0 : index
    %122 = vector.load %arg10[%c0_56, %c0_57, %c0_58] : memref<2x1x32xf32, #tpu.memory_space<vmem>>, vector<1x1x32xf32>
    %123 = vector.shape_cast %122 : vector<1x1x32xf32> to vector<1x32xf32>
    %124 = vector.broadcast %123 : vector<1x32xf32> to vector<16x32xf32>
    %125 = arith.addf %121, %124 : vector<16x32xf32>
    %126 = arith.addf %125, %37 : vector<16x32xf32>
    %c0_59 = arith.constant 0 : index
    %c0_60 = arith.constant 0 : index
    %c0_61 = arith.constant 0 : index
    %127 = vector.load %arg11[%c0_59, %c0_60, %c0_61] : memref<2x1x32xf32, #tpu.memory_space<vmem>>, vector<1x1x32xf32>
    %128 = vector.shape_cast %127 : vector<1x1x32xf32> to vector<1x32xf32>
    %c0_62 = arith.constant 0 : index
    %c0_63 = arith.constant 0 : index
    %c0_64 = arith.constant 0 : index
    %129 = vector.load %arg12[%c0_62, %c0_63, %c0_64] : memref<2x1x32xf32, #tpu.memory_space<vmem>>, vector<1x1x32xf32>
    %130 = vector.shape_cast %129 : vector<1x1x32xf32> to vector<1x32xf32>
    %cst_65 = arith.constant dense<0.000000e+00> : vector<16xf32>
    %131 = vector.multi_reduction <add>, %126, %cst_65 [1] : vector<16x32xf32> to vector<16xf32>
    %132 = vector.shape_cast %131 : vector<16xf32> to vector<16x1xf32>
    %cst_66 = arith.constant 3.200000e+01 : f32
    %133 = vector.broadcast %cst_66 : f32 to vector<16x1xf32>
    %134 = arith.divf %132, %133 : vector<16x1xf32>
    %135 = vector.broadcast %134 : vector<16x1xf32> to vector<16x32xf32>
    %136 = arith.subf %126, %135 : vector<16x32xf32>
    %137 = arith.mulf %136, %136 : vector<16x32xf32>
    %cst_67 = arith.constant dense<0.000000e+00> : vector<16xf32>
    %138 = vector.multi_reduction <add>, %137, %cst_67 [1] : vector<16x32xf32> to vector<16xf32>
    %139 = vector.shape_cast %138 : vector<16xf32> to vector<16x1xf32>
    %cst_68 = arith.constant 3.200000e+01 : f32
    %140 = vector.broadcast %cst_68 : f32 to vector<16x1xf32>
    %141 = arith.divf %139, %140 : vector<16x1xf32>
    %142 = vector.broadcast %134 : vector<16x1xf32> to vector<16x32xf32>
    %143 = arith.subf %126, %142 : vector<16x32xf32>
    %cst_69 = arith.constant 9.99999996E-13 : f32
    %144 = vector.broadcast %cst_69 : f32 to vector<16x1xf32>
    %145 = arith.addf %141, %144 : vector<16x1xf32>
    %146 = math.rsqrt %145 : vector<16x1xf32>
    %147 = vector.broadcast %146 : vector<16x1xf32> to vector<16x32xf32>
    %148 = arith.mulf %143, %147 : vector<16x32xf32>
    %149 = vector.broadcast %128 : vector<1x32xf32> to vector<16x32xf32>
    %150 = arith.mulf %148, %149 : vector<16x32xf32>
    %151 = vector.broadcast %130 : vector<1x32xf32> to vector<16x32xf32>
    %152 = arith.addf %150, %151 : vector<16x32xf32>
    %c0_70 = arith.constant 0 : index
    %c0_71 = arith.constant 0 : index
    %c0_72 = arith.constant 0 : index
    %153 = vector.load %arg13[%c0_70, %c0_71, %c0_72] : memref<2x32x64xf32, #tpu.memory_space<vmem>>, vector<1x32x64xf32>
    %154 = vector.shape_cast %153 : vector<1x32x64xf32> to vector<32x64xf32>
    %cst_73 = arith.constant dense<0.000000e+00> : vector<16x64xf32>
    %155 = tpu.matmul %152, %154, %cst_73 {dimension_numbers = #tpu.dot_dimension_numbers<[1], [0], [0], [1], [0, 0, 1, 1], [], []>} : vector<16x32xf32>, vector<32x64xf32>, vector<16x64xf32> -> vector<16x64xf32>
    %c0_74 = arith.constant 0 : index
    %c0_75 = arith.constant 0 : index
    %c0_76 = arith.constant 0 : index
    %156 = vector.load %arg14[%c0_74, %c0_75, %c0_76] : memref<2x1x64xf32, #tpu.memory_space<vmem>>, vector<1x1x64xf32>
    %157 = vector.shape_cast %156 : vector<1x1x64xf32> to vector<1x64xf32>
    %158 = vector.broadcast %157 : vector<1x64xf32> to vector<16x64xf32>
    %159 = arith.addf %155, %158 : vector<16x64xf32>
    %cst_77 = arith.constant 5.000000e-01 : f32
    %160 = vector.broadcast %cst_77 : f32 to vector<16x64xf32>
    %161 = arith.mulf %160, %159 : vector<16x64xf32>
    %cst_78 = arith.constant 4.471500e-02 : f32
    %162 = vector.broadcast %cst_78 : f32 to vector<16x64xf32>
    %163 = arith.mulf %162, %159 : vector<16x64xf32>
    %164 = arith.mulf %163, %159 : vector<16x64xf32>
    %165 = arith.mulf %164, %159 : vector<16x64xf32>
    %166 = arith.addf %159, %165 : vector<16x64xf32>
    %cst_79 = arith.constant 0.797884583 : f32
    %167 = vector.broadcast %cst_79 : f32 to vector<16x64xf32>
    %168 = arith.mulf %167, %166 : vector<16x64xf32>
    %169 = math.tanh %168 : vector<16x64xf32>
    %cst_80 = arith.constant 1.000000e+00 : f32
    %170 = vector.broadcast %cst_80 : f32 to vector<16x64xf32>
    %171 = arith.addf %170, %169 : vector<16x64xf32>
    %172 = arith.mulf %161, %171 : vector<16x64xf32>
    %c0_81 = arith.constant 0 : index
    %c0_82 = arith.constant 0 : index
    %c0_83 = arith.constant 0 : index
    %173 = vector.load %arg15[%c0_81, %c0_82, %c0_83] : memref<2x64x32xf32, #tpu.memory_space<vmem>>, vector<1x64x32xf32>
    %174 = vector.shape_cast %173 : vector<1x64x32xf32> to vector<64x32xf32>
    %cst_84 = arith.constant dense<0.000000e+00> : vector<16x32xf32>
    %175 = tpu.matmul %172, %174, %cst_84 {dimension_numbers = #tpu.dot_dimension_numbers<[1], [0], [0], [1], [0, 0, 1, 1], [], []>} : vector<16x64xf32>, vector<64x32xf32>, vector<16x32xf32> -> vector<16x32xf32>
    %c0_85 = arith.constant 0 : index
    %c0_86 = arith.constant 0 : index
    %c0_87 = arith.constant 0 : index
    %176 = vector.load %arg16[%c0_85, %c0_86, %c0_87] : memref<2x1x32xf32, #tpu.memory_space<vmem>>, vector<1x1x32xf32>
    %177 = vector.shape_cast %176 : vector<1x1x32xf32> to vector<1x32xf32>
    %178 = vector.broadcast %177 : vector<1x32xf32> to vector<16x32xf32>
    %179 = arith.addf %175, %178 : vector<16x32xf32>
    %180 = arith.addf %179, %152 : vector<16x32xf32>
    %c0_88 = arith.constant 0 : index
    %c0_89 = arith.constant 0 : index
    %c0_90 = arith.constant 0 : index
    %181 = vector.load %arg17[%c0_88, %c0_89, %c0_90] : memref<2x1x32xf32, #tpu.memory_space<vmem>>, vector<1x1x32xf32>
    %182 = vector.shape_cast %181 : vector<1x1x32xf32> to vector<1x32xf32>
    %c0_91 = arith.constant 0 : index
    %c0_92 = arith.constant 0 : index
    %c0_93 = arith.constant 0 : index
    %183 = vector.load %arg18[%c0_91, %c0_92, %c0_93] : memref<2x1x32xf32, #tpu.memory_space<vmem>>, vector<1x1x32xf32>
    %184 = vector.shape_cast %183 : vector<1x1x32xf32> to vector<1x32xf32>
    %cst_94 = arith.constant dense<0.000000e+00> : vector<16xf32>
    %185 = vector.multi_reduction <add>, %180, %cst_94 [1] : vector<16x32xf32> to vector<16xf32>
    %186 = vector.shape_cast %185 : vector<16xf32> to vector<16x1xf32>
    %cst_95 = arith.constant 3.200000e+01 : f32
    %187 = vector.broadcast %cst_95 : f32 to vector<16x1xf32>
    %188 = arith.divf %186, %187 : vector<16x1xf32>
    %189 = vector.broadcast %188 : vector<16x1xf32> to vector<16x32xf32>
    %190 = arith.subf %180, %189 : vector<16x32xf32>
    %191 = arith.mulf %190, %190 : vector<16x32xf32>
    %cst_96 = arith.constant dense<0.000000e+00> : vector<16xf32>
    %192 = vector.multi_reduction <add>, %191, %cst_96 [1] : vector<16x32xf32> to vector<16xf32>
    %193 = vector.shape_cast %192 : vector<16xf32> to vector<16x1xf32>
    %cst_97 = arith.constant 3.200000e+01 : f32
    %194 = vector.broadcast %cst_97 : f32 to vector<16x1xf32>
    %195 = arith.divf %193, %194 : vector<16x1xf32>
    %196 = vector.broadcast %188 : vector<16x1xf32> to vector<16x32xf32>
    %197 = arith.subf %180, %196 : vector<16x32xf32>
    %cst_98 = arith.constant 9.99999996E-13 : f32
    %198 = vector.broadcast %cst_98 : f32 to vector<16x1xf32>
    %199 = arith.addf %195, %198 : vector<16x1xf32>
    %200 = math.rsqrt %199 : vector<16x1xf32>
    %201 = vector.broadcast %200 : vector<16x1xf32> to vector<16x32xf32>
    %202 = arith.mulf %197, %201 : vector<16x32xf32>
    %203 = vector.broadcast %182 : vector<1x32xf32> to vector<16x32xf32>
    %204 = arith.mulf %202, %203 : vector<16x32xf32>
    %205 = vector.broadcast %184 : vector<1x32xf32> to vector<16x32xf32>
    %206 = arith.addf %204, %205 : vector<16x32xf32>
    %c1 = arith.constant 1 : index
    %c0_99 = arith.constant 0 : index
    %c0_100 = arith.constant 0 : index
    %207 = vector.load %arg7[%c1, %c0_99, %c0_100] : memref<2x32x96xf32, #tpu.memory_space<vmem>>, vector<1x32x96xf32>
    %208 = vector.shape_cast %207 : vector<1x32x96xf32> to vector<32x96xf32>
    %cst_101 = arith.constant dense<0.000000e+00> : vector<16x96xf32>
    %209 = tpu.matmul %206, %208, %cst_101 {dimension_numbers = #tpu.dot_dimension_numbers<[1], [0], [0], [1], [0, 0, 1, 1], [], []>} : vector<16x32xf32>, vector<32x96xf32>, vector<16x96xf32> -> vector<16x96xf32>
    %c1_102 = arith.constant 1 : index
    %c0_103 = arith.constant 0 : index
    %c0_104 = arith.constant 0 : index
    %210 = vector.load %arg8[%c1_102, %c0_103, %c0_104] : memref<2x1x96xf32, #tpu.memory_space<vmem>>, vector<1x1x96xf32>
    %211 = vector.shape_cast %210 : vector<1x1x96xf32> to vector<1x96xf32>
    %212 = vector.broadcast %211 : vector<1x96xf32> to vector<16x96xf32>
    %213 = arith.addf %209, %212 : vector<16x96xf32>
    %214 = vector.extract_strided_slice %213 {offsets = [0, 0], sizes = [16, 8], strides = [1, 1]} : vector<16x96xf32> to vector<16x8xf32>
    %215 = vector.extract_strided_slice %213 {offsets = [0, 32], sizes = [16, 8], strides = [1, 1]} : vector<16x96xf32> to vector<16x8xf32>
    %216 = vector.extract_strided_slice %213 {offsets = [0, 64], sizes = [16, 8], strides = [1, 1]} : vector<16x96xf32> to vector<16x8xf32>
    "tpu.trace_start"() <{level = 10 : i32, message = "qd,kd->qk"}> : () -> ()
    %cst_105 = arith.constant dense<0.000000e+00> : vector<16x16xf32>
    %217 = tpu.matmul %214, %215, %cst_105 {dimension_numbers = #tpu.dot_dimension_numbers<[1], [1], [0], [0], [0, 0, 1, 0], [], []>} : vector<16x8xf32>, vector<16x8xf32>, vector<16x16xf32> -> vector<16x16xf32>
    "tpu.trace_stop"() : () -> ()
    %cst_106 = arith.constant 0.353553385 : f32
    %218 = vector.broadcast %cst_106 : f32 to vector<16x16xf32>
    %219 = arith.mulf %217, %218 : vector<16x16xf32>
    %220 = arith.addf %219, %38 : vector<16x16xf32>
    %cst_107 = arith.constant dense<0xFF800000> : vector<16xf32>
    %221 = vector.multi_reduction <maximumf>, %220, %cst_107 [1] : vector<16x16xf32> to vector<16xf32>
    %222 = vector.shape_cast %221 : vector<16xf32> to vector<16x1xf32>
    %223 = vector.broadcast %222 : vector<16x1xf32> to vector<16x16xf32>
    %224 = arith.subf %220, %223 : vector<16x16xf32>
    %225 = math.exp %224 : vector<16x16xf32>
    %cst_108 = arith.constant dense<0.000000e+00> : vector<16xf32>
    %226 = vector.multi_reduction <add>, %225, %cst_108 [1] : vector<16x16xf32> to vector<16xf32>
    %227 = vector.shape_cast %226 : vector<16xf32> to vector<16x1xf32>
    %228 = vector.broadcast %227 : vector<16x1xf32> to vector<16x16xf32>
    %229 = arith.divf %225, %228 : vector<16x16xf32>
    %cst_109 = arith.constant dense<0.000000e+00> : vector<16x8xf32>
    %230 = tpu.matmul %229, %216, %cst_109 {dimension_numbers = #tpu.dot_dimension_numbers<[1], [0], [0], [1], [0, 0, 1, 1], [], []>} : vector<16x16xf32>, vector<16x8xf32>, vector<16x8xf32> -> vector<16x8xf32>
    %c0_110 = arith.constant 0 : index
    %c0_111 = arith.constant 0 : index
    %231 = vector.load %arg22[%c0_110, %c0_111] : memref<16x32xf32, #tpu.memory_space<vmem>>, vector<16x8xf32>
    tpu.vector_store %arg22[%c0_110, %c0_111], %230 {strides = array<i32>} : memref<16x32xf32, #tpu.memory_space<vmem>>, vector<16x8xf32>,
    %232 = vector.extract_strided_slice %213 {offsets = [0, 8], sizes = [16, 8], strides = [1, 1]} : vector<16x96xf32> to vector<16x8xf32>
    %233 = vector.extract_strided_slice %213 {offsets = [0, 40], sizes = [16, 8], strides = [1, 1]} : vector<16x96xf32> to vector<16x8xf32>
    %234 = vector.extract_strided_slice %213 {offsets = [0, 72], sizes = [16, 8], strides = [1, 1]} : vector<16x96xf32> to vector<16x8xf32>
    "tpu.trace_start"() <{level = 10 : i32, message = "qd,kd->qk"}> : () -> ()
    %cst_112 = arith.constant dense<0.000000e+00> : vector<16x16xf32>
    %235 = tpu.matmul %232, %233, %cst_112 {dimension_numbers = #tpu.dot_dimension_numbers<[1], [1], [0], [0], [0, 0, 1, 0], [], []>} : vector<16x8xf32>, vector<16x8xf32>, vector<16x16xf32> -> vector<16x16xf32>
    "tpu.trace_stop"() : () -> ()
    %cst_113 = arith.constant 0.353553385 : f32
    %236 = vector.broadcast %cst_113 : f32 to vector<16x16xf32>
    %237 = arith.mulf %235, %236 : vector<16x16xf32>
    %238 = arith.addf %237, %38 : vector<16x16xf32>
    %cst_114 = arith.constant dense<0xFF800000> : vector<16xf32>
    %239 = vector.multi_reduction <maximumf>, %238, %cst_114 [1] : vector<16x16xf32> to vector<16xf32>
    %240 = vector.shape_cast %239 : vector<16xf32> to vector<16x1xf32>
    %241 = vector.broadcast %240 : vector<16x1xf32> to vector<16x16xf32>
    %242 = arith.subf %238, %241 : vector<16x16xf32>
    %243 = math.exp %242 : vector<16x16xf32>
    %cst_115 = arith.constant dense<0.000000e+00> : vector<16xf32>
    %244 = vector.multi_reduction <add>, %243, %cst_115 [1] : vector<16x16xf32> to vector<16xf32>
    %245 = vector.shape_cast %244 : vector<16xf32> to vector<16x1xf32>
    %246 = vector.broadcast %245 : vector<16x1xf32> to vector<16x16xf32>
    %247 = arith.divf %243, %246 : vector<16x16xf32>
    %cst_116 = arith.constant dense<0.000000e+00> : vector<16x8xf32>
    %248 = tpu.matmul %247, %234, %cst_116 {dimension_numbers = #tpu.dot_dimension_numbers<[1], [0], [0], [1], [0, 0, 1, 1], [], []>} : vector<16x16xf32>, vector<16x8xf32>, vector<16x8xf32> -> vector<16x8xf32>
    %c0_117 = arith.constant 0 : index
    %c8_118 = arith.constant 8 : index
    %249 = vector.load %arg22[%c0_117, %c8_118] : memref<16x32xf32, #tpu.memory_space<vmem>>, vector<16x8xf32>
    tpu.vector_store %arg22[%c0_117, %c8_118], %248 {strides = array<i32>} : memref<16x32xf32, #tpu.memory_space<vmem>>, vector<16x8xf32>,
    %250 = vector.extract_strided_slice %213 {offsets = [0, 16], sizes = [16, 8], strides = [1, 1]} : vector<16x96xf32> to vector<16x8xf32>
    %251 = vector.extract_strided_slice %213 {offsets = [0, 48], sizes = [16, 8], strides = [1, 1]} : vector<16x96xf32> to vector<16x8xf32>
    %252 = vector.extract_strided_slice %213 {offsets = [0, 80], sizes = [16, 8], strides = [1, 1]} : vector<16x96xf32> to vector<16x8xf32>
    "tpu.trace_start"() <{level = 10 : i32, message = "qd,kd->qk"}> : () -> ()
    %cst_119 = arith.constant dense<0.000000e+00> : vector<16x16xf32>
    %253 = tpu.matmul %250, %251, %cst_119 {dimension_numbers = #tpu.dot_dimension_numbers<[1], [1], [0], [0], [0, 0, 1, 0], [], []>} : vector<16x8xf32>, vector<16x8xf32>, vector<16x16xf32> -> vector<16x16xf32>
    "tpu.trace_stop"() : () -> ()
    %cst_120 = arith.constant 0.353553385 : f32
    %254 = vector.broadcast %cst_120 : f32 to vector<16x16xf32>
    %255 = arith.mulf %253, %254 : vector<16x16xf32>
    %256 = arith.addf %255, %38 : vector<16x16xf32>
    %cst_121 = arith.constant dense<0xFF800000> : vector<16xf32>
    %257 = vector.multi_reduction <maximumf>, %256, %cst_121 [1] : vector<16x16xf32> to vector<16xf32>
    %258 = vector.shape_cast %257 : vector<16xf32> to vector<16x1xf32>
    %259 = vector.broadcast %258 : vector<16x1xf32> to vector<16x16xf32>
    %260 = arith.subf %256, %259 : vector<16x16xf32>
    %261 = math.exp %260 : vector<16x16xf32>
    %cst_122 = arith.constant dense<0.000000e+00> : vector<16xf32>
    %262 = vector.multi_reduction <add>, %261, %cst_122 [1] : vector<16x16xf32> to vector<16xf32>
    %263 = vector.shape_cast %262 : vector<16xf32> to vector<16x1xf32>
    %264 = vector.broadcast %263 : vector<16x1xf32> to vector<16x16xf32>
    %265 = arith.divf %261, %264 : vector<16x16xf32>
    %cst_123 = arith.constant dense<0.000000e+00> : vector<16x8xf32>
    %266 = tpu.matmul %265, %252, %cst_123 {dimension_numbers = #tpu.dot_dimension_numbers<[1], [0], [0], [1], [0, 0, 1, 1], [], []>} : vector<16x16xf32>, vector<16x8xf32>, vector<16x8xf32> -> vector<16x8xf32>
    %c0_124 = arith.constant 0 : index
    %c16_125 = arith.constant 16 : index
    %267 = vector.load %arg22[%c0_124, %c16_125] : memref<16x32xf32, #tpu.memory_space<vmem>>, vector<16x8xf32>
    tpu.vector_store %arg22[%c0_124, %c16_125], %266 {strides = array<i32>} : memref<16x32xf32, #tpu.memory_space<vmem>>, vector<16x8xf32>,
    %268 = vector.extract_strided_slice %213 {offsets = [0, 24], sizes = [16, 8], strides = [1, 1]} : vector<16x96xf32> to vector<16x8xf32>
    %269 = vector.extract_strided_slice %213 {offsets = [0, 56], sizes = [16, 8], strides = [1, 1]} : vector<16x96xf32> to vector<16x8xf32>
    %270 = vector.extract_strided_slice %213 {offsets = [0, 88], sizes = [16, 8], strides = [1, 1]} : vector<16x96xf32> to vector<16x8xf32>
    "tpu.trace_start"() <{level = 10 : i32, message = "qd,kd->qk"}> : () -> ()
    %cst_126 = arith.constant dense<0.000000e+00> : vector<16x16xf32>
    %271 = tpu.matmul %268, %269, %cst_126 {dimension_numbers = #tpu.dot_dimension_numbers<[1], [1], [0], [0], [0, 0, 1, 0], [], []>} : vector<16x8xf32>, vector<16x8xf32>, vector<16x16xf32> -> vector<16x16xf32>
    "tpu.trace_stop"() : () -> ()
    %cst_127 = arith.constant 0.353553385 : f32
    %272 = vector.broadcast %cst_127 : f32 to vector<16x16xf32>
    %273 = arith.mulf %271, %272 : vector<16x16xf32>
    %274 = arith.addf %273, %38 : vector<16x16xf32>
    %cst_128 = arith.constant dense<0xFF800000> : vector<16xf32>
    %275 = vector.multi_reduction <maximumf>, %274, %cst_128 [1] : vector<16x16xf32> to vector<16xf32>
    %276 = vector.shape_cast %275 : vector<16xf32> to vector<16x1xf32>
    %277 = vector.broadcast %276 : vector<16x1xf32> to vector<16x16xf32>
    %278 = arith.subf %274, %277 : vector<16x16xf32>
    %279 = math.exp %278 : vector<16x16xf32>
    %cst_129 = arith.constant dense<0.000000e+00> : vector<16xf32>
    %280 = vector.multi_reduction <add>, %279, %cst_129 [1] : vector<16x16xf32> to vector<16xf32>
    %281 = vector.shape_cast %280 : vector<16xf32> to vector<16x1xf32>
    %282 = vector.broadcast %281 : vector<16x1xf32> to vector<16x16xf32>
    %283 = arith.divf %279, %282 : vector<16x16xf32>
    %cst_130 = arith.constant dense<0.000000e+00> : vector<16x8xf32>
    %284 = tpu.matmul %283, %270, %cst_130 {dimension_numbers = #tpu.dot_dimension_numbers<[1], [0], [0], [1], [0, 0, 1, 1], [], []>} : vector<16x16xf32>, vector<16x8xf32>, vector<16x8xf32> -> vector<16x8xf32>
    %c0_131 = arith.constant 0 : index
    %c24_132 = arith.constant 24 : index
    %285 = vector.load %arg22[%c0_131, %c24_132] : memref<16x32xf32, #tpu.memory_space<vmem>>, vector<16x8xf32>
    tpu.vector_store %arg22[%c0_131, %c24_132], %284 {strides = array<i32>} : memref<16x32xf32, #tpu.memory_space<vmem>>, vector<16x8xf32>,
    %c0_133 = arith.constant 0 : index
    %c0_134 = arith.constant 0 : index
    %286 = vector.load %arg22[%c0_133, %c0_134] : memref<16x32xf32, #tpu.memory_space<vmem>>, vector<16x32xf32>
    %c1_135 = arith.constant 1 : index
    %c0_136 = arith.constant 0 : index
    %c0_137 = arith.constant 0 : index
    %287 = vector.load %arg9[%c1_135, %c0_136, %c0_137] : memref<2x32x32xf32, #tpu.memory_space<vmem>>, vector<1x32x32xf32>
    %288 = vector.shape_cast %287 : vector<1x32x32xf32> to vector<32x32xf32>
    %cst_138 = arith.constant dense<0.000000e+00> : vector<16x32xf32>
    %289 = tpu.matmul %286, %288, %cst_138 {dimension_numbers = #tpu.dot_dimension_numbers<[1], [0], [0], [1], [0, 0, 1, 1], [], []>} : vector<16x32xf32>, vector<32x32xf32>, vector<16x32xf32> -> vector<16x32xf32>
    %c1_139 = arith.constant 1 : index
    %c0_140 = arith.constant 0 : index
    %c0_141 = arith.constant 0 : index
    %290 = vector.load %arg10[%c1_139, %c0_140, %c0_141] : memref<2x1x32xf32, #tpu.memory_space<vmem>>, vector<1x1x32xf32>
    %291 = vector.shape_cast %290 : vector<1x1x32xf32> to vector<1x32xf32>
    %292 = vector.broadcast %291 : vector<1x32xf32> to vector<16x32xf32>
    %293 = arith.addf %289, %292 : vector<16x32xf32>
    %294 = arith.addf %293, %206 : vector<16x32xf32>
    %c1_142 = arith.constant 1 : index
    %c0_143 = arith.constant 0 : index
    %c0_144 = arith.constant 0 : index
    %295 = vector.load %arg11[%c1_142, %c0_143, %c0_144] : memref<2x1x32xf32, #tpu.memory_space<vmem>>, vector<1x1x32xf32>
    %296 = vector.shape_cast %295 : vector<1x1x32xf32> to vector<1x32xf32>
    %c1_145 = arith.constant 1 : index
    %c0_146 = arith.constant 0 : index
    %c0_147 = arith.constant 0 : index
    %297 = vector.load %arg12[%c1_145, %c0_146, %c0_147] : memref<2x1x32xf32, #tpu.memory_space<vmem>>, vector<1x1x32xf32>
    %298 = vector.shape_cast %297 : vector<1x1x32xf32> to vector<1x32xf32>
    %cst_148 = arith.constant dense<0.000000e+00> : vector<16xf32>
    %299 = vector.multi_reduction <add>, %294, %cst_148 [1] : vector<16x32xf32> to vector<16xf32>
    %300 = vector.shape_cast %299 : vector<16xf32> to vector<16x1xf32>
    %cst_149 = arith.constant 3.200000e+01 : f32
    %301 = vector.broadcast %cst_149 : f32 to vector<16x1xf32>
    %302 = arith.divf %300, %301 : vector<16x1xf32>
    %303 = vector.broadcast %302 : vector<16x1xf32> to vector<16x32xf32>
    %304 = arith.subf %294, %303 : vector<16x32xf32>
    %305 = arith.mulf %304, %304 : vector<16x32xf32>
    %cst_150 = arith.constant dense<0.000000e+00> : vector<16xf32>
    %306 = vector.multi_reduction <add>, %305, %cst_150 [1] : vector<16x32xf32> to vector<16xf32>
    %307 = vector.shape_cast %306 : vector<16xf32> to vector<16x1xf32>
    %cst_151 = arith.constant 3.200000e+01 : f32
    %308 = vector.broadcast %cst_151 : f32 to vector<16x1xf32>
    %309 = arith.divf %307, %308 : vector<16x1xf32>
    %310 = vector.broadcast %302 : vector<16x1xf32> to vector<16x32xf32>
    %311 = arith.subf %294, %310 : vector<16x32xf32>
    %cst_152 = arith.constant 9.99999996E-13 : f32
    %312 = vector.broadcast %cst_152 : f32 to vector<16x1xf32>
    %313 = arith.addf %309, %312 : vector<16x1xf32>
    %314 = math.rsqrt %313 : vector<16x1xf32>
    %315 = vector.broadcast %314 : vector<16x1xf32> to vector<16x32xf32>
    %316 = arith.mulf %311, %315 : vector<16x32xf32>
    %317 = vector.broadcast %296 : vector<1x32xf32> to vector<16x32xf32>
    %318 = arith.mulf %316, %317 : vector<16x32xf32>
    %319 = vector.broadcast %298 : vector<1x32xf32> to vector<16x32xf32>
    %320 = arith.addf %318, %319 : vector<16x32xf32>
    %c1_153 = arith.constant 1 : index
    %c0_154 = arith.constant 0 : index
    %c0_155 = arith.constant 0 : index
    %321 = vector.load %arg13[%c1_153, %c0_154, %c0_155] : memref<2x32x64xf32, #tpu.memory_space<vmem>>, vector<1x32x64xf32>
    %322 = vector.shape_cast %321 : vector<1x32x64xf32> to vector<32x64xf32>
    %cst_156 = arith.constant dense<0.000000e+00> : vector<16x64xf32>
    %323 = tpu.matmul %320, %322, %cst_156 {dimension_numbers = #tpu.dot_dimension_numbers<[1], [0], [0], [1], [0, 0, 1, 1], [], []>} : vector<16x32xf32>, vector<32x64xf32>, vector<16x64xf32> -> vector<16x64xf32>
    %c1_157 = arith.constant 1 : index
    %c0_158 = arith.constant 0 : index
    %c0_159 = arith.constant 0 : index
    %324 = vector.load %arg14[%c1_157, %c0_158, %c0_159] : memref<2x1x64xf32, #tpu.memory_space<vmem>>, vector<1x1x64xf32>
    %325 = vector.shape_cast %324 : vector<1x1x64xf32> to vector<1x64xf32>
    %326 = vector.broadcast %325 : vector<1x64xf32> to vector<16x64xf32>
    %327 = arith.addf %323, %326 : vector<16x64xf32>
    %cst_160 = arith.constant 5.000000e-01 : f32
    %328 = vector.broadcast %cst_160 : f32 to vector<16x64xf32>
    %329 = arith.mulf %328, %327 : vector<16x64xf32>
    %cst_161 = arith.constant 4.471500e-02 : f32
    %330 = vector.broadcast %cst_161 : f32 to vector<16x64xf32>
    %331 = arith.mulf %330, %327 : vector<16x64xf32>
    %332 = arith.mulf %331, %327 : vector<16x64xf32>
    %333 = arith.mulf %332, %327 : vector<16x64xf32>
    %334 = arith.addf %327, %333 : vector<16x64xf32>
    %cst_162 = arith.constant 0.797884583 : f32
    %335 = vector.broadcast %cst_162 : f32 to vector<16x64xf32>
    %336 = arith.mulf %335, %334 : vector<16x64xf32>
    %337 = math.tanh %336 : vector<16x64xf32>
    %cst_163 = arith.constant 1.000000e+00 : f32
    %338 = vector.broadcast %cst_163 : f32 to vector<16x64xf32>
    %339 = arith.addf %338, %337 : vector<16x64xf32>
    %340 = arith.mulf %329, %339 : vector<16x64xf32>
    %c1_164 = arith.constant 1 : index
    %c0_165 = arith.constant 0 : index
    %c0_166 = arith.constant 0 : index
    %341 = vector.load %arg15[%c1_164, %c0_165, %c0_166] : memref<2x64x32xf32, #tpu.memory_space<vmem>>, vector<1x64x32xf32>
    %342 = vector.shape_cast %341 : vector<1x64x32xf32> to vector<64x32xf32>
    %cst_167 = arith.constant dense<0.000000e+00> : vector<16x32xf32>
    %343 = tpu.matmul %340, %342, %cst_167 {dimension_numbers = #tpu.dot_dimension_numbers<[1], [0], [0], [1], [0, 0, 1, 1], [], []>} : vector<16x64xf32>, vector<64x32xf32>, vector<16x32xf32> -> vector<16x32xf32>
    %c1_168 = arith.constant 1 : index
    %c0_169 = arith.constant 0 : index
    %c0_170 = arith.constant 0 : index
    %344 = vector.load %arg16[%c1_168, %c0_169, %c0_170] : memref<2x1x32xf32, #tpu.memory_space<vmem>>, vector<1x1x32xf32>
    %345 = vector.shape_cast %344 : vector<1x1x32xf32> to vector<1x32xf32>
    %346 = vector.broadcast %345 : vector<1x32xf32> to vector<16x32xf32>
    %347 = arith.addf %343, %346 : vector<16x32xf32>
    %348 = arith.addf %347, %320 : vector<16x32xf32>
    %c1_171 = arith.constant 1 : index
    %c0_172 = arith.constant 0 : index
    %c0_173 = arith.constant 0 : index
    %349 = vector.load %arg17[%c1_171, %c0_172, %c0_173] : memref<2x1x32xf32, #tpu.memory_space<vmem>>, vector<1x1x32xf32>
    %350 = vector.shape_cast %349 : vector<1x1x32xf32> to vector<1x32xf32>
    %c1_174 = arith.constant 1 : index
    %c0_175 = arith.constant 0 : index
    %c0_176 = arith.constant 0 : index
    %351 = vector.load %arg18[%c1_174, %c0_175, %c0_176] : memref<2x1x32xf32, #tpu.memory_space<vmem>>, vector<1x1x32xf32>
    %352 = vector.shape_cast %351 : vector<1x1x32xf32> to vector<1x32xf32>
    %cst_177 = arith.constant dense<0.000000e+00> : vector<16xf32>
    %353 = vector.multi_reduction <add>, %348, %cst_177 [1] : vector<16x32xf32> to vector<16xf32>
    %354 = vector.shape_cast %353 : vector<16xf32> to vector<16x1xf32>
    %cst_178 = arith.constant 3.200000e+01 : f32
    %355 = vector.broadcast %cst_178 : f32 to vector<16x1xf32>
    %356 = arith.divf %354, %355 : vector<16x1xf32>
    %357 = vector.broadcast %356 : vector<16x1xf32> to vector<16x32xf32>
    %358 = arith.subf %348, %357 : vector<16x32xf32>
    %359 = arith.mulf %358, %358 : vector<16x32xf32>
    %cst_179 = arith.constant dense<0.000000e+00> : vector<16xf32>
    %360 = vector.multi_reduction <add>, %359, %cst_179 [1] : vector<16x32xf32> to vector<16xf32>
    %361 = vector.shape_cast %360 : vector<16xf32> to vector<16x1xf32>
    %cst_180 = arith.constant 3.200000e+01 : f32
    %362 = vector.broadcast %cst_180 : f32 to vector<16x1xf32>
    %363 = arith.divf %361, %362 : vector<16x1xf32>
    %364 = vector.broadcast %356 : vector<16x1xf32> to vector<16x32xf32>
    %365 = arith.subf %348, %364 : vector<16x32xf32>
    %cst_181 = arith.constant 9.99999996E-13 : f32
    %366 = vector.broadcast %cst_181 : f32 to vector<16x1xf32>
    %367 = arith.addf %363, %366 : vector<16x1xf32>
    %368 = math.rsqrt %367 : vector<16x1xf32>
    %369 = vector.broadcast %368 : vector<16x1xf32> to vector<16x32xf32>
    %370 = arith.mulf %365, %369 : vector<16x32xf32>
    %371 = vector.broadcast %350 : vector<1x32xf32> to vector<16x32xf32>
    %372 = arith.mulf %370, %371 : vector<16x32xf32>
    %373 = vector.broadcast %352 : vector<1x32xf32> to vector<16x32xf32>
    %374 = arith.addf %372, %373 : vector<16x32xf32>
    %375 = vector.extract_strided_slice %374 {offsets = [0, 0], sizes = [1, 32], strides = [1, 1]} : vector<16x32xf32> to vector<1x32xf32>
    %376 = vector.extract_strided_slice %374 {offsets = [8, 0], sizes = [1, 32], strides = [1, 1]} : vector<16x32xf32> to vector<1x32xf32>
    %377 = tpu.concatenate %375, %376 in 0 : vector<1x32xf32>, vector<1x32xf32> -> vector<2x32xf32>
    %c0_182 = arith.constant 0 : index
    %c0_183 = arith.constant 0 : index
    %378 = vector.load %arg19[%c0_182, %c0_183] : memref<32x128xf32, #tpu.memory_space<vmem>>, vector<32x128xf32>
    %cst_184 = arith.constant dense<0.000000e+00> : vector<2x128xf32>
    %379 = tpu.matmul %377, %378, %cst_184 {dimension_numbers = #tpu.dot_dimension_numbers<[1], [0], [0], [1], [0, 0, 1, 1], [], []>} : vector<2x32xf32>, vector<32x128xf32>, vector<2x128xf32> -> vector<2x128xf32>
    %c0_185 = arith.constant 0 : index
    %c0_186 = arith.constant 0 : index
    %380 = vector.load %arg20[%c0_185, %c0_186] : memref<1x128xf32, #tpu.memory_space<vmem>>, vector<1x128xf32>
    %381 = vector.broadcast %380 : vector<1x128xf32> to vector<2x128xf32>
    %382 = arith.addf %379, %381 : vector<2x128xf32>
    %c0_187 = arith.constant 0 : index
    %c0_188 = arith.constant 0 : index
    %383 = vector.load %arg21[%c0_187, %c0_188] : memref<2x128xf32, #tpu.memory_space<vmem>>, vector<2x128xf32>
    tpu.vector_store %arg21[%c0_187, %c0_188], %382 {strides = array<i32>} : memref<2x128xf32, #tpu.memory_space<vmem>>, vector<2x128xf32>,
    return
  }
}

</mosaic_0001>

<bundles_post_ra>
// kernel: eq.8
= control target key start
LH: loop header
LB: loop body
LE: loop exit
PB: predicated region body
PF: predicated region fallthrough
CT: control target
= control target key end

     0   :  { %vm7_vm0 = vcmask 64512   ;;  %vm13_vm1 = vcmask 130112   ;;  %s39_s0 = inlined_call_operand.vmem [shape: s32[2,8], index: 0, kind: input, shape index: {}]   ;;  %s40_s1 = inlined_call_operand.vmem [shape: s32[16], index: 1, kind: output, shape index: {}]  }
   0x1   :  { %v4_v0 = vld [vmem:[%s39_s0] sm:$0x3]  ;;  %s22_s0 = smov 8  }
   0x2   :  { %5 = vst [vmem:[#allocation1] sm:$0x3] %v4_v0 }
   0x9   :  { %v10_v1 = vld [vmem:[#allocation1 + $0x1] sm:$0x1]   ;;  %v6_v2 = vld [vmem:[#allocation1] sm:$0x1]  }
   0xa   :  { %11 = vrot.lane.b32.xlu0 %v10_v1, %s22_s0  ;;  %8 = vst.msk [vmem:[#allocation0] sm:$0x1] %vm7_vm0, %v6_v2  }
  0x7c   :  { %v12_v3 = vpop.permute.xlu0 %11  }
  0x7d   :  { %14 = vst.msk [vmem:[#allocation0] sm:$0x1] %vm13_vm1, %v12_v3  }
  0x84   :  { %v17_v4 = vld [vmem:[#allocation0] sm:$0x1] }
  0x85   :  { %20 = vst [vmem:[%s40_s1] sm:$0x1] %v17_v4 }

// kernel: mul.8
= control target key start
LH: loop header
LB: loop body
LE: loop exit
PB: predicated region body
PF: predicated region fallthrough
CT: control target
= control target key end

     0   :  { %vm7_vm0 = vcmask 64512   ;;  %vm13_vm1 = vcmask 130112   ;;  %s39_s0 = inlined_call_operand.vmem [shape: f32[2,8], index: 0, kind: input, shape index: {}]   ;;  %s40_s1 = inlined_call_operand.vmem [shape: f32[16], index: 1, kind: output, shape index: {}]  }
   0x1   :  { %v4_v0 = vld [vmem:[%s39_s0] sm:$0x3]  ;;  %s22_s0 = smov 8  }
   0x2   :  { %5 = vst [vmem:[#allocation1] sm:$0x3] %v4_v0 }
   0x9   :  { %v10_v1 = vld [vmem:[#allocation1 + $0x1] sm:$0x1]   ;;  %v6_v2 = vld [vmem:[#allocation1] sm:$0x1]  }
   0xa   :  { %11 = vrot.lane.b32.xlu0 %v10_v1, %s22_s0  ;;  %8 = vst.msk [vmem:[#allocation0] sm:$0x1] %vm7_vm0, %v6_v2  }
  0x7c   :  { %v12_v3 = vpop.permute.xlu0 %11  }
  0x7d   :  { %14 = vst.msk [vmem:[#allocation0] sm:$0x1] %vm13_vm1, %v12_v3  }
  0x84   :  { %v17_v4 = vld [vmem:[#allocation0] sm:$0x1] }
  0x85   :  { %20 = vst [vmem:[%s40_s1] sm:$0x1] %v17_v4 }

// kernel: bert_for_classification_forward.1
= control target key start
LH: loop header
LB: loop body
LE: loop exit
PB: predicated region body
PF: predicated region fallthrough
CT: control target
= control target key end

     0   :  { %v2170_v0 = vmov 0   ;;  %v70_v19 = vlaneseq  ;;  %v2171_v22 = vmov 1.0   ;;  %vm132_vm2 = vcmask 261120   ;;  %s2173_s25 = smov 96   ;;  %s2174_s27 = smov 88   ;;  %s2977_s0 = inlined_call_operand.vmem [shape: s32[16,1], index: 0, kind: input, shape index: {}]   ;;  %s2978_s2 = inlined_call_operand.vmem [shape: f32[128,32], index: 2, kind: input, shape index: {}]   ;;  %s2979_s4 = inlined_call_operand.vmem [shape: f32[1,32], index: 4, kind: input, shape index: {}]   ;;  %s2980_s3 = inlined_call_operand.vmem [shape: f32[16,32], index: 3, kind: input, shape index: {}]   ;;  %s2981_s5 = inlined_call_operand.vmem [shape: f32[1,32], index: 5, kind: input, shape index: {}]   ;;  %s2982_s6 = inlined_call_operand.vmem [shape: f32[1,32], index: 6, kind: input, shape index: {}]   ;;  %s2983_s8 = inlined_call_operand.vmem [shape: f32[2,1,96], index: 8, kind: input, shape index: {}]   ;;  %s2984_s7 = inlined_call_operand.vmem [shape: f32[2,32,96], index: 7, kind: input, shape index: {}]   ;;  %s2985_s1 = inlined_call_operand.vmem [shape: f32[16,16], index: 1, kind: input, shape index: {}]   ;;  %s2986_s10 = inlined_call_operand.vmem [shape: f32[2,1,32], index: 10, kind: input, shape index: {}]   ;;  %s2987_s9 = inlined_call_operand.vmem [shape: f32[2,32,32], index: 9, kind: input, shape index: {}]   ;;  %s2988_s11 = inlined_call_operand.vmem [shape: f32[2,1,32], index: 11, kind: input, shape index: {}]   ;;  %s2989_s12 = inlined_call_operand.vmem [shape: f32[2,1,32], index: 12, kind: input, shape index: {}]   ;;  %s2990_s14 = inlined_call_operand.vmem [shape: f32[2,1,64], index: 14, kind: input, shape index: {}]   ;;  %s2991_s13 = inlined_call_operand.vmem [shape: f32[2,32,64], index: 13, kind: input, shape index: {}]   ;;  %s2992_s16 = inlined_call_operand.vmem [shape: f32[2,1,32], index: 16, kind: input, shape index: {}]   ;;  %s2993_s15 = inlined_call_operand.vmem [shape: f32[2,64,32], index: 15, kind: input, shape index: {}]   ;;  %s2994_s17 = inlined_call_operand.vmem [shape: f32[2,1,32], index: 17, kind: input, shape index: {}]   ;;  %s2995_s18 = inlined_call_operand.vmem [shape: f32[2,1,32], index: 18, kind: input, shape index: {}]   ;;  %s2996_s20 = inlined_call_operand.vmem [shape: f32[1,128], index: 20, kind: input, shape index: {}]   ;;  %s2997_s19 = inlined_call_operand.vmem [shape: f32[32,128], index: 19, kind: input, shape index: {}]   ;;  %s2998_s21 = inlined_call_operand.vmem [shape: f32[2,128], index: 21, kind: output, shape index: {}]  }
   0x1   :  { %3015 = sst [smem:[#allocation3_spill]] %s2977_s0  ;;  %2013 = vset.pattern.permute.xlu0 %v2170_v0  ;;  %v2172_v34 = vmov 32.0   ;;  %v199_v51 = vld [vmem:[%s2984_s7 + $0x18] sm:$0xff]  ;;  %v198_v52 = vld [vmem:[%s2984_s7 + $0x10] sm:$0xff]  ;;  %v197_v53 = vld [vmem:[%s2984_s7 + $0x8] sm:$0xff]  ;;  %vm239_vm10 = vcmask 64512  }
   0x2   :  { %3016 = sst [smem:[#allocation4_spill]] %s2978_s2  ;;  %v71_v20 = vand.u32 127, %v70_v19  ;;  %2074 = vrcp.f32 %v2172_v34  ;;  %222 = vmatpush.msra.mxu1 %v199_v51  ;;  %v196_v54 = vld [vmem:[%s2984_s7] sm:$0xff]  ;;  %vm275_vm11 = vcmask 130048   ;;  %s3004_s30 = smov 64  }
   0x3   :  { %3017 = sst [smem:[#allocation5_spill]] %s2979_s4  ;;  %v2057_v19 = vld [vmem:[%s2983_s8] ss:$0 sm:$0xff]  ;;  %s2180_s2 = smov 72  }
   0x4   :  { %3018 = sst [smem:[#allocation6_spill]] %s2980_s3  ;;  %223 = vmatpush.msra.mxu1 %v198_v52  ;;  %s2175_s3 = smov 120  }
   0x5   :  { %3019 = sst [smem:[#allocation7_spill]] %s2981_s5  ;;  %s3013_s29 = smov 8  }
   0x6   :  { %3020 = sst [smem:[#allocation8_spill]] %s2982_s6  ;;  %224 = vmatpush.msra.mxu1 %v197_v53  ;;  %s3002_s6 = smov 56  }
   0x7   :  { %s3021_s26 = sld [smem:[#allocation3_spill]]  ;;  %s3007_s0 = smov 24  }
   0x8   :  { %s3022_s28 = sld [smem:[#allocation4_spill]]  ;;  %v2075_v35 = vpop.eup %2074  ;;  %225 = vmatpush.msra.mxu1 %v196_v54  ;;  %s3011_s5 = smov 16  }
   0x9   :  { %s3023_s23 = sld [smem:[#allocation6_spill]]  ;;  %v140_v36 = vmul.f32 32.0, %v2075_v35  ;;  %vm144_vm3 = vweird.f32 %v2075_v35 }
   0xa   :  { %s3024_s4 = sld [smem:[#allocation5_spill]] }
   0xb   :  { %v141_v37 = vsub.f32 1.0, %v140_v36  ;;  %s3025_s22 = sld [smem:[#allocation7_spill]] }
   0xc   :  { %s3026_s24 = sld [smem:[#allocation8_spill]] }
   0xd   :  { %v68_v1 = vld [vmem:[%s3021_s26] sm:$0xff]  ;;  %v69_v6 = vld [vmem:[%s3021_s26 + $0x8] sm:$0xff]  ;;  %v142_v38 = vmul.f32 %v2075_v35, %v141_v37 }
   0xe   :  { %v99_v2 = vld [vmem:[%s3022_s28 + $0x78] sm:$0xff]  ;;  %73 = vperm.xlu0 %2013, %v68_v1   ;;  %v98_v3 = vld [vmem:[%s3022_s28 + $0x70] sm:$0xff]  ;;  %v97_v4 = vld [vmem:[%s3022_s28 + $0x68] sm:$0xff] }
   0xf   :  { %101 = vmatpush.msra.mxu0 %v99_v2  ;;  %v96_v5 = vld [vmem:[%s3022_s28 + $0x60] sm:$0xff]  ;;  %v95_v7 = vld [vmem:[%s3022_s28 + $0x58] sm:$0xff]  ;;  %v94_v8 = vld [vmem:[%s3022_s28 + $0x50] sm:$0xff]  ;;  %v143_v39 = vadd.f32 %v2075_v35, %v142_v38 }
  0x10   :  { %v93_v9 = vld [vmem:[%s3022_s28 + $0x48] sm:$0xff]  ;;  %v92_v10 = vld [vmem:[%s3022_s28 + $0x40] sm:$0xff]  ;;  %v91_v11 = vld [vmem:[%s3022_s28 + $0x38] sm:$0xff] }
  0x11   :  { %102 = vmatpush.msra.mxu0 %v98_v3  ;;  %v90_v12 = vld [vmem:[%s3022_s28 + $0x30] sm:$0xff]  ;;  %v89_v13 = vld [vmem:[%s3022_s28 + $0x28] sm:$0xff]  ;;  %v88_v14 = vld [vmem:[%s3022_s28 + $0x20] sm:$0xff]  ;;  %v2359_v40 = vsel %vm144_vm3, %v2075_v35, %v143_v39 }
  0x12   :  { %v87_v15 = vld [vmem:[%s3022_s28 + $0x18] sm:$0xff]  ;;  %v86_v16 = vld [vmem:[%s3022_s28 + $0x10] sm:$0xff]  ;;  %v85_v17 = vld [vmem:[%s3022_s28 + $0x8] sm:$0xff] }
  0x13   :  { %103 = vmatpush.msra.mxu0 %v97_v4  ;;  %v84_v18 = vld [vmem:[%s3022_s28] sm:$0xff]  ;;  %s3001_s28 = smov 48  }
  0x14   :  { %v100_v24 = vld [vmem:[%s3023_s23] sm:$0xff]  ;;  %s3009_s23 = smov 112  }
  0x15   :  { %104 = vmatpush.msra.mxu0 %v96_v5  ;;  %v2054_v25 = vld [vmem:[%s3024_s4] ss:$0 sm:$0xff]  ;;  %s3003_s4 = smov 40  }
  0x16   :  { %76 = vperm.xlu0 %2013, %v69_v6   ;;  %v2055_v5 = vld [vmem:[%s3025_s22] ss:$0 sm:$0xff]  ;;  %s2178_s22 = smov 80  }
  0x17   :  { %105 = vmatpush.msra.mxu0 %v95_v7 }
  0x19   :  { %106 = vmatpush.msra.mxu0 %v94_v8 }
  0x1b   :  { %107 = vmatpush.msra.mxu0 %v93_v9  ;;  %v2056_v9 = vld [vmem:[%s3026_s24] ss:$0 sm:$0xff]  ;;  %s3005_s24 = smov 104  }
  0x1d   :  { %108 = vmatpush.msra.mxu0 %v92_v10 }
  0x1f   :  { %109 = vmatpush.msra.mxu0 %v91_v11 }
  0x21   :  { %110 = vmatpush.msra.mxu0 %v90_v12 }
  0x23   :  { %111 = vmatpush.msra.mxu0 %v89_v13 }
  0x25   :  { %112 = vmatpush.msra.mxu0 %v88_v14 }
  0x27   :  { %113 = vmatpush.msra.mxu0 %v87_v15 }
  0x29   :  { %114 = vmatpush.msra.mxu0 %v86_v16 }
  0x2b   :  { %115 = vmatpush.msra.mxu0 %v85_v17 }
  0x2d   :  { %116 = vmatpush.msra.mxu0 %v84_v18 }
  0x80   :  { %v74_v21 = vpop.permute.xlu0 %73 }
  0x81   :  { %vm78_vm0 = vcmp.eq.s32.totalorder %v71_v20, %v74_v21 }
  0x82   :  { %1901 = vmatmul.msk.f32.vlgmr.msra.gmra.mxu0 %vm78_vm0, %v2171_v22 }
  0x88   :  { %v77_v23 = vpop.permute.xlu0 %76 }
  0x89   :  { %vm79_vm1 = vcmp.eq.s32.totalorder %v71_v20, %v77_v23 }
  0x8a   :  { %1902 = vmatmul.msk.f32.gmra.mxu0 %vm79_vm1, %v2171_v22 }
  0xff   :  { %v118_v26 = vpop.f32.mrf.mxu0 }
 0x100   :  { %v119_v27 = vadd.f32 %v118_v26, %v100_v24 }
 0x102   :  { %v128_v28 = vadd.f32 %v2054_v25, %v119_v27  ;;  %v2419_v27 = vld [vmem:[%s2985_s1] sm:$0xff] }
 0x104   :  { %v133_v29 = vsel %vm132_vm2, %v128_v28, 0.0 }
 0x105   :  { %134 = vadd.xlane.f32.xlu1 %v133_v29 }
 0x107   :  { %v121_v30 = vpop.f32.mrf.mxu0 }
 0x108   :  { %v122_v31 = vadd.f32 %v121_v30, %v100_v24 }
 0x10a   :  { %v129_v32 = vadd.f32 %v2054_v25, %v122_v31 }
 0x10c   :  { %v136_v33 = vsel %vm132_vm2, %v129_v32, 0.0 }
 0x10d   :  { %137 = vadd.xlane.f32.xlu1 %v136_v33 }
 0x178   :  { %v135_v41 = vpop.xlane.xlu1 %134 }
 0x179   :  { %v146_v42 = vmul.f32 %v2359_v40, %v135_v41 }
 0x17b   :  { %v148_v43 = vsub.f32 %v128_v28, %v146_v42 }
 0x17d   :  { %v150_v44 = vmul.f32 %v148_v43, %v148_v43 }
 0x17f   :  { %v152_v45 = vsel %vm132_vm2, %v150_v44, 0.0 }
 0x180   :  { %153 = vadd.xlane.f32.xlu2 %v152_v45  ;;  %v138_v46 = vpop.xlane.xlu1 %137 }
 0x181   :  { %v147_v47 = vmul.f32 %v2359_v40, %v138_v46 }
 0x183   :  { %v149_v48 = vsub.f32 %v129_v32, %v147_v47  ;;  %v2426_v32 = vld [vmem:[%s2985_s1 + $0x8] sm:$0xff] }
 0x185   :  { %v151_v49 = vmul.f32 %v149_v48, %v149_v48 }
 0x187   :  { %v155_v50 = vsel %vm132_vm2, %v151_v49, 0.0 }
 0x188   :  { %156 = vadd.xlane.f32.xlu2 %v155_v50 }
 0x1f3   :  { %v154_v55 = vpop.xlane.xlu2 %153 }
 0x1f4   :  { %v158_v56 = vmul.f32 %v154_v55, %v2359_v40 }
 0x1f6   :  { %v160_v57 = vadd.f32 1e-12, %v158_v56 }
 0x1f8   :  { %2076 = vrsqrt.f32 %v160_v57  ;;  %vm168_vm5 = vweird.f32 %v160_v57 }
 0x1fb   :  { %v157_v58 = vpop.xlane.xlu2 %156 }
 0x1fc   :  { %v159_v59 = vmul.f32 %v157_v58, %v2359_v40 }
 0x1fe   :  { %v2077_v60 = vpop.eup %2076  ;;  %v161_v61 = vadd.f32 1e-12, %v159_v59 }
 0x1ff   :  { %v163_v62 = vmul.f32 %v2077_v60, %v160_v57  ;;  %vm169_vm4 = vweird.f32 %v2077_v60 }
 0x200   :  { %2078 = vrsqrt.f32 %v161_v61  ;;  %vm170_vm6 = vmor %vm168_vm5, %vm169_vm4  ;;  %vm178_vm8 = vweird.f32 %v161_v61 }
 0x201   :  { %v164_v63 = vmul.f32 %v2077_v60, %v163_v62 }
 0x203   :  { %v165_v0 = vmul.f32 0.5, %v164_v63 }
 0x205   :  { %v166_v1 = vsub.f32 1.5, %v165_v0 }
 0x206   :  { %v2079_v2 = vpop.eup %2078 }
 0x207   :  { %v167_v3 = vmul.f32 %v2077_v60, %v166_v1  ;;  %v173_v4 = vmul.f32 %v2079_v2, %v161_v61  ;;  %vm179_vm7 = vweird.f32 %v2079_v2 }
 0x208   :  { %vm180_vm9 = vmor %vm178_vm8, %vm179_vm7 }
 0x209   :  { %v171_v6 = vsel %vm170_vm6, %v2077_v60, %v167_v3  ;;  %v174_v7 = vmul.f32 %v2079_v2, %v173_v4 }
 0x20a   :  { %v182_v8 = vmul.f32 %v171_v6, %v148_v43 }
 0x20b   :  { %v175_v10 = vmul.f32 0.5, %v174_v7 }
 0x20c   :  { %v187_v11 = vmul.f32 %v2055_v5, %v182_v8 }
 0x20d   :  { %v176_v12 = vsub.f32 1.5, %v175_v10 }
 0x20e   :  { %v2385_v13 = vadd.f32 %v2056_v9, %v187_v11 }
 0x20f   :  { %v177_v14 = vmul.f32 %v2079_v2, %v176_v12 }
 0x210   :  { %1903 = vmatmul.msk.f32.vlgmr.msra.gmra.mxu1 %vm132_vm2, %v2385_v13 }
 0x211   :  { %v181_v15 = vsel %vm180_vm9, %v2079_v2, %v177_v14 }
 0x212   :  { %v183_v16 = vmul.f32 %v181_v15, %v149_v48 }
 0x214   :  { %v188_v17 = vmul.f32 %v2055_v5, %v183_v16 }
 0x216   :  { %v2389_v18 = vadd.f32 %v2056_v9, %v188_v17 }
 0x218   :  { %1904 = vmatmul.msk.f32.gmra.mxu1 %vm132_vm2, %v2389_v18 }
 0x28d   :  { %v227_v20 = vpop.f32.mrf.mxu1 }
 0x28e   :  { %v2396_v21 = vadd.f32 %v2057_v19, %v227_v20 }
 0x290   :  { %235 = vrot.lane.b32.xlu1 %v2396_v21, %s2173_s25 }
 0x295   :  { %v230_v22 = vpop.f32.mrf.mxu1 }
 0x296   :  { %v2400_v23 = vadd.f32 %v2057_v19, %v230_v22 }
 0x298   :  { %367 = vrot.lane.b32.xlu1 %v2400_v23, %s2174_s27  ;;  %237 = vrot.lane.b32.xlu0 %v2400_v23, %s2173_s25  ;;  %v2432_v36 = vpack.i.bf16 %v2396_v21, %v2400_v23 }
 0x2a0   :  { %365 = vrot.lane.b32.xlu1 %v2396_v21, %s2174_s27 }
 0x2a8   :  { %361 = vrot.lane.b32.xlu1 %v2396_v21, %s2175_s3 }
 0x302   :  { %v236_v25 = vpop.permute.xlu1 %235 }
 0x30a   :  { %v238_v24 = vpop.permute.xlu0 %237  ;;  %v368_v41 = vpop.permute.xlu1 %367 }
 0x30b   :  { %1905 = vmatpush.xpose.msk.msra.mxu2 %vm239_vm10, %v238_v24 }
 0x30f   :  { %1906 = vmatpush.xpose.msk.msra.mxu2 %vm239_vm10, %v236_v25 }
 0x312   :  { %1907 = vmatmul.msk.f32.vlgmr.msra.gmra.mxu2 %vm239_vm10, %v2396_v21  ;;  %v366_v50 = vpop.permute.xlu1 %365 }
 0x31a   :  { %1908 = vmatmul.msk.f32.gmra.mxu2 %vm239_vm10, %v2400_v23  ;;  %v362_v19 = vpop.permute.xlu1 %361 }
 0x395   :  { %v265_v26 = vpop.f32.mrf.mxu2 }
 0x396   :  { %v271_v28 = vmul.f32 0.35355338, %v265_v26 }
 0x398   :  { %v273_v29 = vadd.f32 %v271_v28, %v2419_v27 }
 0x39a   :  { %v276_v30 = vsel %vm275_vm11, %v273_v29, -inf }
 0x39b   :  { %277 = vmax.xlane.f32.xlu2 %v276_v30 }
 0x39d   :  { %v268_v31 = vpop.f32.mrf.mxu2 }
 0x39e   :  { %v272_v33 = vmul.f32 0.35355338, %v268_v31 }
 0x3a0   :  { %v274_v34 = vadd.f32 %v272_v33, %v2426_v32 }
 0x3a2   :  { %v279_v35 = vsel %vm275_vm11, %v274_v34, -inf }
 0x3a3   :  { %280 = vmax.xlane.f32.xlu0 %v279_v35 }
 0x3b3   :  { %2015 = vrot.lane.b32.xlu2 %v2432_v36, %s3004_s30 }
 0x3b7   :  { %2020 = vrot.lane.b32.xlu0 %v2432_v36, %s3002_s6  ;;  %s3030_s6 = smov 40  }
 0x3bf   :  { %504 = vrot.lane.b32.xlu0 %v2400_v23, %s2178_s22 }
 0x3c7   :  { %498 = vrot.lane.b32.xlu0 %v2396_v21, %s3009_s23 }
 0x40e   :  { %v278_v37 = vpop.xlane.xlu2 %277 }
 0x40f   :  { %v282_v38 = vsub.f32 %v273_v29, %v278_v37 }
 0x411   :  { %v284_v39 = vmul.f32 1.442695, %v282_v38 }
 0x413   :  { %2080 = vpow2.f32 %v284_v39 }
 0x416   :  { %v2016_v42 = vpop.permute.xlu2 %2015  ;;  %v281_v43 = vpop.xlane.xlu0 %280 }
 0x417   :  { %v283_v44 = vsub.f32 %v274_v34, %v281_v43  ;;  %v2017_v45 = vunpack.i.l.bf16 %v2016_v42  ;;  %v2018_v48 = vunpack.i.h.bf16 %v2016_v42 }
 0x419   :  { %v2081_v46 = vpop.eup %2080  ;;  %v286_v47 = vmul.f32 1.442695, %v283_v44  ;;  %350 = vmatpush.msra.mxu3 %v2017_v45 }
 0x41a   :  { %v288_v49 = vsel %vm275_vm11, %v2081_v46, 0.0 }
 0x41b   :  { %2082 = vpow2.f32 %v286_v47  ;;  %289 = vadd.xlane.f32.xlu2 %v288_v49  ;;  %351 = vmatpush.msra.mxu3 %v2018_v48 }
 0x41d   :  { %1911 = vmatpush.xpose.msk.msrb.mxu3 %vm239_vm10, %v368_v41 }
 0x421   :  { %1912 = vmatpush.xpose.msk.msrb.mxu3 %vm239_vm10, %v366_v50  ;;  %v2083_v51 = vpop.eup %2082 }
 0x422   :  { %v291_v52 = vsel %vm275_vm11, %v2083_v51, 0.0 }
 0x423   :  { %292 = vadd.xlane.f32.xlu2 %v291_v52 }
 0x429   :  { %v2021_v53 = vpop.permute.xlu0 %2020 }
 0x42a   :  { %v2022_v54 = vunpack.i.l.bf16 %v2021_v53  ;;  %v2023_v55 = vunpack.i.h.bf16 %v2021_v53 }
 0x42c   :  { %478 = vmatpush.msrb.mxu1 %v2022_v54 }
 0x42e   :  { %479 = vmatpush.msrb.mxu1 %v2023_v55 }
 0x431   :  { %v505_v56 = vpop.permute.xlu0 %504 }
 0x432   :  { %1917 = vmatpush.xpose.msk.msrb.mxu2 %vm239_vm10, %v505_v56 }
 0x439   :  { %v499_v35 = vpop.permute.xlu0 %498 }
 0x43b   :  { %363 = vrot.lane.b32.xlu2 %v2400_v23, %s2175_s3 }
 0x48e   :  { %v290_v57 = vpop.xlane.xlu2 %289 }
 0x48f   :  { %2084 = vrcp.f32 %v290_v57  ;;  %v305_v62 = vand.u32 2147483648, %v290_v57  ;;  %v303_v0 = vand.u32 2147483647, %v290_v57  ;;  %vm299_vm13 = vweird.f32 %v290_v57 }
 0x491   :  { %v306_v3 = vor.u32 1.1754944e-38, %v305_v62  ;;  %vm304_vm15 = vcmp.eq.f32.partialorder %v303_v0, 8.507059e+37 }
 0x495   :  { %v2085_v58 = vpop.eup %2084 }
 0x496   :  { %v295_v59 = vmul.f32 %v2085_v58, %v290_v57  ;;  %v293_v60 = vpop.xlane.xlu2 %292  ;;  %vm300_vm12 = vweird.f32 %v2085_v58 }
 0x497   :  { %2086 = vrcp.f32 %v293_v60  ;;  %vm301_vm14 = vmor %vm299_vm13, %vm300_vm12  ;;  %v320_v9 = vand.u32 2147483648, %v293_v60  ;;  %v318_v11 = vand.u32 2147483647, %v293_v60  ;;  %vm314_vm1 = vweird.f32 %v293_v60 }
 0x498   :  { %v296_v61 = vsub.f32 1.0, %v295_v59 }
 0x499   :  { %v321_v14 = vor.u32 1.1754944e-38, %v320_v9  ;;  %vm319_vm4 = vcmp.eq.f32.partialorder %v318_v11, 8.507059e+37 }
 0x49a   :  { %v297_v63 = vmul.f32 %v2085_v58, %v296_v61 }
 0x49c   :  { %v298_v1 = vadd.f32 %v2085_v58, %v297_v63 }
 0x49d   :  { %v2087_v2 = vpop.eup %2086 }
 0x49e   :  { %v310_v4 = vmul.f32 %v2087_v2, %v293_v60  ;;  %v302_v5 = vsel %vm301_vm14, %v2085_v58, %v298_v1  ;;  %vm315_vm0 = vweird.f32 %v2087_v2  ;;  %v364_v20 = vpop.permute.xlu2 %363 }
 0x49f   :  { %v307_v6 = vsel %vm304_vm15, %v306_v3, %v302_v5  ;;  %vm316_vm3 = vmor %vm314_vm1, %vm315_vm0 }
 0x4a0   :  { %v311_v7 = vsub.f32 1.0, %v310_v4  ;;  %v308_v8 = vmul.f32 %v2081_v46, %v307_v6 }
 0x4a2   :  { %v312_v10 = vmul.f32 %v2087_v2, %v311_v7  ;;  %1909 = vmatmul.msk.f32.vlgmr.msra.gmra.mxu3 %vm275_vm11, %v308_v8 }
 0x4a4   :  { %v313_v12 = vadd.f32 %v2087_v2, %v312_v10 }
 0x4a6   :  { %v317_v15 = vsel %vm316_vm3, %v2087_v2, %v313_v12 }
 0x4a7   :  { %v322_v16 = vsel %vm319_vm4, %v321_v14, %v317_v15 }
 0x4a8   :  { %v323_v17 = vmul.f32 %v2083_v51, %v322_v16 }
 0x4aa   :  { %1910 = vmatmul.msk.f32.gmra.mxu3 %vm275_vm11, %v323_v17 }
 0x4b2   :  { %1913 = vmatmul.msk.f32.vlgmr.msrb.gmra.mxu3 %vm239_vm10, %v362_v19 }
 0x4ba   :  { %1914 = vmatmul.msk.f32.gmra.mxu3 %vm239_vm10, %v364_v20 }
 0x525   :  { %v353_v22 = vpop.f32.mrf.mxu3 }
 0x526   :  { %359 = vst.msk [vmem:[#allocation2] sm:$0xff] %vm239_vm10, %v353_v22 }
 0x52d   :  { %v356_v24 = vpop.f32.mrf.mxu3 }
 0x52e   :  { %360 = vst.msk [vmem:[#allocation2 + $0x8] sm:$0xff] %vm239_vm10, %v356_v24 }
 0x535   :  { %v394_v25 = vpop.f32.mrf.mxu3 }
 0x536   :  { %v400_v26 = vmul.f32 0.35355338, %v394_v25 }
 0x538   :  { %v402_v28 = vadd.f32 %v400_v26, %v2419_v27 }
 0x53a   :  { %v404_v29 = vsel %vm275_vm11, %v402_v28, -inf }
 0x53b   :  { %405 = vmax.xlane.f32.xlu1 %v404_v29 }
 0x53d   :  { %v397_v30 = vpop.f32.mrf.mxu3 }
 0x53e   :  { %v401_v31 = vmul.f32 0.35355338, %v397_v30 }
 0x540   :  { %v403_v33 = vadd.f32 %v401_v31, %v2426_v32 }
 0x542   :  { %v407_v34 = vsel %vm275_vm11, %v403_v33, -inf }
 0x543   :  { %408 = vmax.xlane.f32.xlu0 %v407_v34 }
 0x554   :  { %502 = vrot.lane.b32.xlu1 %v2396_v21, %s2178_s22 }
 0x557   :  { %639 = vrot.lane.b32.xlu0 %v2396_v21, %s2180_s2 }
 0x55c   :  { %500 = vrot.lane.b32.xlu1 %v2400_v23, %s3009_s23  ;;  %s3031_s23 = smov 56  }
 0x55f   :  { %635 = vrot.lane.b32.xlu0 %v2396_v21, %s3005_s24 }
 0x5ae   :  { %v406_v37 = vpop.xlane.xlu1 %405 }
 0x5af   :  { %v410_v38 = vsub.f32 %v402_v28, %v406_v37 }
 0x5b1   :  { %v412_v39 = vmul.f32 1.442695, %v410_v38 }
 0x5b3   :  { %2088 = vpow2.f32 %v412_v39 }
 0x5b6   :  { %v409_v41 = vpop.xlane.xlu0 %408 }
 0x5b7   :  { %v411_v42 = vsub.f32 %v403_v33, %v409_v41 }
 0x5b9   :  { %v2089_v43 = vpop.eup %2088  ;;  %v414_v44 = vmul.f32 1.442695, %v411_v42 }
 0x5ba   :  { %v416_v45 = vsel %vm275_vm11, %v2089_v43, 0.0 }
 0x5bb   :  { %2090 = vpow2.f32 %v414_v44  ;;  %417 = vadd.xlane.f32.xlu2 %v416_v45 }
 0x5c1   :  { %v2091_v46 = vpop.eup %2090 }
 0x5c2   :  { %v419_v47 = vsel %vm275_vm11, %v2091_v46, 0.0 }
 0x5c3   :  { %420 = vadd.xlane.f32.xlu0 %v419_v47 }
 0x5c6   :  { %v503_v48 = vpop.permute.xlu1 %502 }
 0x5c7   :  { %1918 = vmatpush.xpose.msk.msrb.mxu2 %vm239_vm10, %v503_v48 }
 0x5c9   :  { %v640_v49 = vpop.permute.xlu0 %639 }
 0x5ca   :  { %1919 = vmatmul.msk.f32.vlgmr.msrb.gmra.mxu2 %vm239_vm10, %v499_v35 }
 0x5ce   :  { %v501_v21 = vpop.permute.xlu1 %500 }
 0x5d1   :  { %v636_v50 = vpop.permute.xlu0 %635 }
 0x5d2   :  { %1920 = vmatmul.msk.f32.gmra.mxu2 %vm239_vm10, %v501_v21 }
 0x5d3   :  { %641 = vrot.lane.b32.xlu2 %v2400_v23, %s2180_s2 }
 0x5d7   :  { %637 = vrot.lane.b32.xlu0 %v2400_v23, %s3005_s24  ;;  %s3032_s24 = smov 48  }
 0x62e   :  { %v418_v51 = vpop.xlane.xlu2 %417 }
 0x62f   :  { %2092 = vrcp.f32 %v418_v51  ;;  %v433_v57 = vand.u32 2147483648, %v418_v51  ;;  %v431_v59 = vand.u32 2147483647, %v418_v51  ;;  %vm427_vm6 = vweird.f32 %v418_v51 }
 0x631   :  { %v434_v61 = vor.u32 1.1754944e-38, %v433_v57  ;;  %vm432_vm8 = vcmp.eq.f32.partialorder %v431_v59, 8.507059e+37 }
 0x635   :  { %v2093_v52 = vpop.eup %2092 }
 0x636   :  { %v423_v53 = vmul.f32 %v2093_v52, %v418_v51  ;;  %v642_v54 = vpop.permute.xlu2 %641  ;;  %v421_v55 = vpop.xlane.xlu0 %420  ;;  %vm428_vm5 = vweird.f32 %v2093_v52 }
 0x637   :  { %2094 = vrcp.f32 %v421_v55  ;;  %1923 = vmatpush.xpose.msk.msra.mxu1 %vm239_vm10, %v642_v54  ;;  %vm429_vm7 = vmor %vm427_vm6, %vm428_vm5  ;;  %v448_v3 = vand.u32 2147483648, %v421_v55  ;;  %v446_v5 = vand.u32 2147483647, %v421_v55  ;;  %vm442_vm12 = vweird.f32 %v421_v55 }
 0x638   :  { %v424_v56 = vsub.f32 1.0, %v423_v53 }
 0x639   :  { %v449_v7 = vor.u32 1.1754944e-38, %v448_v3  ;;  %vm447_vm14 = vcmp.eq.f32.partialorder %v446_v5, 8.507059e+37 }
 0x63a   :  { %v425_v58 = vmul.f32 %v2093_v52, %v424_v56 }
 0x63b   :  { %1924 = vmatpush.xpose.msk.msra.mxu1 %vm239_vm10, %v640_v49 }
 0x63c   :  { %v426_v60 = vadd.f32 %v2093_v52, %v425_v58 }
 0x63d   :  { %v2095_v23 = vpop.eup %2094 }
 0x63e   :  { %v438_v62 = vmul.f32 %v2095_v23, %v421_v55  ;;  %v430_v63 = vsel %vm429_vm7, %v2093_v52, %v426_v60  ;;  %vm443_vm9 = vweird.f32 %v2095_v23 }
 0x63f   :  { %v435_v0 = vsel %vm432_vm8, %v434_v61, %v430_v63  ;;  %vm444_vm13 = vmor %vm442_vm12, %vm443_vm9 }
 0x640   :  { %v439_v1 = vsub.f32 1.0, %v438_v62  ;;  %v436_v2 = vmul.f32 %v2089_v43, %v435_v0 }
 0x642   :  { %v440_v4 = vmul.f32 %v2095_v23, %v439_v1  ;;  %1915 = vmatmul.msk.f32.vlgmr.msrb.gmra.mxu1 %vm275_vm11, %v436_v2 }
 0x644   :  { %v441_v6 = vadd.f32 %v2095_v23, %v440_v4 }
 0x646   :  { %v445_v8 = vsel %vm444_vm13, %v2095_v23, %v441_v6 }
 0x647   :  { %v450_v9 = vsel %vm447_vm14, %v449_v7, %v445_v8 }
 0x648   :  { %v451_v10 = vmul.f32 %v2091_v46, %v450_v9 }
 0x649   :  { %v638_v20 = vpop.permute.xlu0 %637 }
 0x64a   :  { %1916 = vmatmul.msk.f32.gmra.mxu1 %vm275_vm11, %v451_v10 }
 0x64d   :  { %v531_v11 = vpop.f32.mrf.mxu2 }
 0x64e   :  { %v537_v12 = vmul.f32 0.35355338, %v531_v11 }
 0x650   :  { %v539_v14 = vadd.f32 %v537_v12, %v2419_v27 }
 0x652   :  { %1925 = vmatmul.msk.f32.vlgmr.msra.gmra.mxu1 %vm239_vm10, %v636_v50  ;;  %v541_v15 = vsel %vm275_vm11, %v539_v14, -inf }
 0x653   :  { %542 = vmax.xlane.f32.xlu2 %v541_v15 }
 0x655   :  { %v534_v16 = vpop.f32.mrf.mxu2 }
 0x656   :  { %v538_v17 = vmul.f32 0.35355338, %v534_v16 }
 0x658   :  { %v540_v19 = vadd.f32 %v538_v17, %v2426_v32 }
 0x65a   :  { %1926 = vmatmul.msk.f32.gmra.mxu1 %vm239_vm10, %v638_v20  ;;  %v544_v22 = vsel %vm275_vm11, %v540_v19, -inf }
 0x65b   :  { %545 = vmax.xlane.f32.xlu0 %v544_v22 }
 0x6bf   :  { %v481_v24 = vpop.f32.mrf.mxu1 }
 0x6c6   :  { %v543_v26 = vpop.xlane.xlu2 %542 }
 0x6c7   :  { %v2486_v25 = vpop.f32.mrf.mxu1  ;;  %v547_v28 = vsub.f32 %v539_v14, %v543_v26 }
 0x6c9   :  { %v549_v29 = vmul.f32 1.442695, %v547_v28 }
 0x6cb   :  { %2096 = vpow2.f32 %v549_v29 }
 0x6ce   :  { %v546_v31 = vpop.xlane.xlu0 %545 }
 0x6cf   :  { %v668_v30 = vpop.f32.mrf.mxu1  ;;  %v548_v35 = vsub.f32 %v540_v19, %v546_v31 }
 0x6d0   :  { %v674_v33 = vmul.f32 0.35355338, %v668_v30 }
 0x6d1   :  { %v551_v38 = vmul.f32 1.442695, %v548_v35  ;;  %v2490_v42 = vpop.eup %2096 }
 0x6d2   :  { %v676_v34 = vadd.f32 %v674_v33, %v2419_v27  ;;  %v553_v44 = vsel %vm275_vm11, %v2490_v42, 0.0 }
 0x6d3   :  { %2098 = vpow2.f32 %v551_v38 }
 0x6d4   :  { %v678_v37 = vsel %vm275_vm11, %v676_v34, -inf }
 0x6d5   :  { %679 = vmax.xlane.f32.xlu1 %v678_v37 }
 0x6d7   :  { %v671_v39 = vpop.f32.mrf.mxu1 }
 0x6d8   :  { %v675_v41 = vmul.f32 0.35355338, %v671_v39 }
 0x6d9   :  { %v2496_v27 = vpop.eup %2098 }
 0x6da   :  { %v677_v43 = vadd.f32 %v675_v41, %v2426_v32  ;;  %v556_v46 = vsel %vm275_vm11, %v2496_v27, 0.0 }
 0x6dc   :  { %v681_v45 = vsel %vm275_vm11, %v677_v43, -inf }
 0x6dd   :  { %554 = vadd.xlane.f32.xlu1 %v553_v44  ;;  %682 = vmax.xlane.f32.xlu2 %v681_v45 }
 0x6e5   :  { %557 = vadd.xlane.f32.xlu2 %v556_v46 }
 0x6fd   :  { %2030 = vrot.lane.b32.xlu2 %v2432_v36, %s3003_s4  ;;  %s3037_s4 = smov 8  }
 0x748   :  { %v680_v47 = vpop.xlane.xlu1 %679 }
 0x749   :  { %v684_v32 = vsub.f32 %v676_v34, %v680_v47 }
 0x74b   :  { %v686_v48 = vmul.f32 1.442695, %v684_v32 }
 0x74d   :  { %2100 = vpow2.f32 %v686_v48 }
 0x750   :  { %v683_v21 = vpop.xlane.xlu2 %682  ;;  %v555_v59 = vpop.xlane.xlu1 %554 }
 0x751   :  { %v685_v49 = vsub.f32 %v677_v43, %v683_v21  ;;  %v570_v10 = vand.u32 2147483648, %v555_v59  ;;  %vm564_vm3 = vweird.f32 %v555_v59  ;;  %v568_v12 = vand.u32 2147483647, %v555_v59 }
 0x753   :  { %v2101_v50 = vpop.eup %2100  ;;  %v688_v51 = vmul.f32 1.442695, %v685_v49  ;;  %vm569_vm7 = vcmp.eq.f32.partialorder %v568_v12, 8.507059e+37 }
 0x754   :  { %v690_v52 = vsel %vm275_vm11, %v2101_v50, 0.0 }
 0x755   :  { %691 = vadd.xlane.f32.xlu0 %v690_v52  ;;  %2102 = vpow2.f32 %v688_v51 }
 0x756   :  { %2104 = vrcp.f32 %v555_v59 }
 0x758   :  { %v2503_v53 = vpop.xlane.xlu2 %557 }
 0x759   :  { %2106 = vrcp.f32 %v2503_v53  ;;  %vm579_vm12 = vweird.f32 %v2503_v53  ;;  %v585_v38 = vand.u32 2147483648, %v2503_v53  ;;  %v583_v44 = vand.u32 2147483647, %v2503_v53 }
 0x75b   :  { %v2505_v54 = vpop.eup %2102  ;;  %v586_v32 = vor.u32 1.1754944e-38, %v585_v38 }
 0x75c   :  { %v693_v55 = vsel %vm275_vm11, %v2505_v54, 0.0  ;;  %v2105_v60 = vpop.eup %2104 }
 0x75d   :  { %694 = vadd.xlane.f32.xlu1 %v693_v55  ;;  %v560_v61 = vmul.f32 %v2105_v60, %v555_v59  ;;  %vm565_vm0 = vweird.f32 %v2105_v60  ;;  %v776_v55 = vld [vmem:[%s2987_s9 + $0x10] sm:$0xff] }
 0x75e   :  { %vm566_vm5 = vmor %vm564_vm3, %vm565_vm0  ;;  %vm495_vm3 = vcmask 130112  }
 0x75f   :  { %v561_v62 = vsub.f32 1.0, %v560_v61  ;;  %v2513_v63 = vpop.eup %2106 }
 0x760   :  { %v2031_v56 = vpop.permute.xlu2 %2030  ;;  %vm580_vm8 = vweird.f32 %v2513_v63 }
 0x761   :  { %v2032_v57 = vunpack.i.l.bf16 %v2031_v56  ;;  %v2033_v58 = vunpack.i.h.bf16 %v2031_v56  ;;  %v562_v2 = vmul.f32 %v2105_v60, %v561_v62  ;;  %vm581_vm14 = vmor %vm579_vm12, %vm580_vm8  ;;  %v775_v56 = vld [vmem:[%s2987_s9 + $0x8] sm:$0xff] }
 0x763   :  { %752 = vmatpush.msra.mxu2 %v2032_v57  ;;  %v563_v8 = vadd.f32 %v2105_v60, %v562_v2 }
 0x765   :  { %753 = vmatpush.msra.mxu2 %v2033_v58  ;;  %v567_v17 = vsel %vm566_vm5, %v2105_v60, %v563_v8  ;;  %vm769_vm5 = vcmask 261312  }
 0x769   :  { %2025 = vrot.lane.b32.xlu0 %v2432_v36, %s3001_s28  ;;  %v575_v36 = vmul.f32 %v2513_v63, %v2503_v53 }
 0x76b   :  { %v576_v9 = vsub.f32 1.0, %v575_v36 }
 0x76d   :  { %v577_v19 = vmul.f32 %v2513_v63, %v576_v9 }
 0x76f   :  { %v578_v37 = vadd.f32 %v2513_v63, %v577_v19  ;;  %v870_v19 = vld [vmem:[%s2991_s13 + $0x8] sm:$0xff] }
 0x771   :  { %v582_v47 = vsel %vm581_vm14, %v2513_v63, %v578_v37  ;;  %v2058_v63 = vld [vmem:[%s2986_s10] ss:$0 sm:$0xff]  ;;  %vm936_vm14 = vcmask 523264  }
 0x776   :  { %489 = vrot.lane.b32.xlu1 %v481_v24, %s3013_s29  ;;  %v571_v24 = vor.u32 1.1754944e-38, %v570_v10 }
 0x778   :  { %v572_v30 = vsel %vm569_vm7, %v571_v24, %v567_v17  ;;  %v871_v17 = vld [vmem:[%s2991_s13 + $0x10] sm:$0xff] }
 0x779   :  { %v573_v41 = vmul.f32 %v2490_v42, %v572_v30 }
 0x7c8   :  { %v692_v23 = vpop.xlane.xlu0 %691 }
 0x7c9   :  { %2108 = vrcp.f32 %v692_v23  ;;  %v707_v5 = vand.u32 2147483648, %v692_v23  ;;  %v705_v7 = vand.u32 2147483647, %v692_v23  ;;  %vm701_vm1 = vweird.f32 %v692_v23 }
 0x7cb   :  { %v708_v14 = vor.u32 1.1754944e-38, %v707_v5  ;;  %vm706_vm6 = vcmp.eq.f32.partialorder %v705_v7, 8.507059e+37 }
 0x7cf   :  { %v2109_v0 = vpop.eup %2108 }
 0x7d0   :  { %v697_v1 = vmul.f32 %v2109_v0, %v692_v23  ;;  %v695_v3 = vpop.xlane.xlu1 %694  ;;  %vm702_vm15 = vweird.f32 %v2109_v0 }
 0x7d1   :  { %2110 = vrcp.f32 %v695_v3  ;;  %vm703_vm4 = vmor %vm701_vm1, %vm702_vm15  ;;  %v722_v31 = vand.u32 2147483648, %v695_v3  ;;  %v720_v35 = vand.u32 2147483647, %v695_v3  ;;  %vm716_vm13 = vweird.f32 %v695_v3 }
 0x7d2   :  { %v698_v4 = vsub.f32 1.0, %v697_v1  ;;  %vm584_vm1 = vcmp.eq.f32.partialorder %v583_v44, 8.507059e+37 }
 0x7d3   :  { %v723_v45 = vor.u32 1.1754944e-38, %v722_v31  ;;  %vm721_vm0 = vcmp.eq.f32.partialorder %v720_v35, 8.507059e+37  ;;  %v587_v49 = vsel %vm584_vm1, %v586_v32, %v582_v47  ;;  %v2060_v47 = vld [vmem:[%s2989_s12] ss:$0 sm:$0xff] }
 0x7d4   :  { %v699_v6 = vmul.f32 %v2109_v0, %v698_v4  ;;  %v588_v42 = vmul.f32 %v2496_v27, %v587_v49  ;;  %v777_v27 = vld [vmem:[%s2987_s9 + $0x18] sm:$0xff] }
 0x7d5   :  { %800 = vmatpush.msrb.mxu0 %v777_v27  ;;  %v930_v27 = vld [vmem:[%s2993_s15 + $0x30] sm:$0xff] }
 0x7d6   :  { %v700_v11 = vadd.f32 %v2109_v0, %v699_v6 }
 0x7d7   :  { %v2111_v15 = vpop.eup %2110  ;;  %801 = vmatpush.msrb.mxu0 %v776_v55  ;;  %v929_v55 = vld [vmem:[%s2993_s15 + $0x28] sm:$0xff] }
 0x7d8   :  { %v704_v16 = vsel %vm703_vm4, %v2109_v0, %v700_v11  ;;  %v712_v22 = vmul.f32 %v2111_v15, %v695_v3  ;;  %vm717_vm9 = vweird.f32 %v2111_v15  ;;  %vm632_vm4 = vcmask 195712  }
 0x7d9   :  { %v709_v20 = vsel %vm706_vm6, %v708_v14, %v704_v16  ;;  %vm718_vm15 = vmor %vm716_vm13, %vm717_vm9  ;;  %802 = vmatpush.msrb.mxu0 %v775_v56  ;;  %v928_v56 = vld [vmem:[%s2993_s15 + $0x20] sm:$0xff] }
 0x7da   :  { %v710_v26 = vmul.f32 %v2101_v50, %v709_v20  ;;  %v713_v28 = vsub.f32 1.0, %v712_v22  ;;  %v869_v20 = vld [vmem:[%s2991_s13] sm:$0xff] }
 0x7db   :  { %v2026_v29 = vpop.permute.xlu0 %2025 }
 0x7dc   :  { %v2027_v33 = vunpack.i.l.bf16 %v2026_v29  ;;  %1927 = vmatmul.msk.f32.vlgmr.msra.gmra.mxu2 %vm275_vm11, %v710_v26  ;;  %v714_v34 = vmul.f32 %v2111_v15, %v713_v28  ;;  %v2028_v39 = vunpack.i.h.bf16 %v2026_v29 }
 0x7de   :  { %615 = vmatpush.msra.mxu3 %v2027_v33  ;;  %v715_v43 = vadd.f32 %v2111_v15, %v714_v34 }
 0x7e0   :  { %616 = vmatpush.msra.mxu3 %v2028_v39  ;;  %v719_v46 = vsel %vm718_vm15, %v2111_v15, %v715_v43 }
 0x7e1   :  { %1921 = vmatmul.msk.f32.vlgmr.msra.gmra.mxu3 %vm275_vm11, %v573_v41  ;;  %v724_v48 = vsel %vm721_vm0, %v723_v45, %v719_v46  ;;  %v2059_v41 = vld [vmem:[%s2988_s11] ss:$0 sm:$0xff] }
 0x7e2   :  { %v725_v21 = vmul.f32 %v2505_v54, %v724_v48 }
 0x7e4   :  { %1928 = vmatmul.msk.f32.gmra.mxu2 %vm275_vm11, %v725_v21 }
 0x7e8   :  { %v490_v50 = vpop.permute.xlu1 %489 }
 0x7e9   :  { %1922 = vmatmul.msk.f32.gmra.mxu3 %vm275_vm11, %v588_v42  ;;  %496 = vst.msk [vmem:[#allocation2] sm:$0xff] %vm495_vm3, %v490_v50 }
 0x85f   :  { %v755_v51 = vpop.f32.mrf.mxu2 }
 0x860   :  { %763 = vrot.lane.b32.xlu2 %v755_v51, %s3007_s0 }
 0x864   :  { %v618_v52 = vpop.f32.mrf.mxu3 }
 0x865   :  { %626 = vrot.lane.b32.xlu0 %v618_v52, %s3011_s5 }
 0x867   :  { %v758_v53 = vpop.f32.mrf.mxu2 }
 0x868   :  { %765 = vrot.lane.b32.xlu2 %v758_v53, %s3007_s0 }
 0x86c   :  { %v621_v54 = vpop.f32.mrf.mxu3 }
 0x86d   :  { %491 = vrot.lane.b32.xlu0 %v2486_v25, %s3013_s29  ;;  %628 = vrot.lane.b32.xlu1 %v621_v54, %s3011_s5  ;;  %v774_v25 = vld [vmem:[%s2987_s9] sm:$0xff]  ;;  %v931_v54 = vld [vmem:[%s2993_s15 + $0x38] sm:$0xff]  ;;  %s3038_s29 = smov 16  }
 0x86e   :  { %803 = vmatpush.msrb.mxu0 %v774_v25  ;;  %951 = vmatpush.msrb.mxu1 %v931_v54  ;;  %v927_v25 = vld [vmem:[%s2993_s15 + $0x18] sm:$0xff] }
 0x870   :  { %952 = vmatpush.msrb.mxu1 %v930_v27 }
 0x872   :  { %953 = vmatpush.msrb.mxu1 %v929_v55 }
 0x874   :  { %954 = vmatpush.msrb.mxu1 %v928_v56 }
 0x876   :  { %955 = vmatpush.msrb.mxu1 %v927_v25  ;;  %v2063_v25 = vld [vmem:[%s2994_s17] ss:$0 sm:$0xff] }
 0x8ba   :  { %v764_v57 = vpop.permute.xlu2 %763 }
 0x8c2   :  { %v766_v61 = vpop.permute.xlu2 %765 }
 0x8d7   :  { %v627_v58 = vpop.permute.xlu0 %626 }
 0x8d8   :  { %633 = vst.msk [vmem:[#allocation2] sm:$0xff] %vm632_vm4, %v627_v58  ;;  %v925_v58 = vld [vmem:[%s2993_s15 + $0x8] sm:$0xff] }
 0x8d9   :  { %770 = vst.msk [vmem:[#allocation2] sm:$0xff] %vm769_vm5, %v764_v57  ;;  %v926_v57 = vld [vmem:[%s2993_s15 + $0x10] sm:$0xff] }
 0x8da   :  { %956 = vmatpush.msrb.mxu1 %v926_v57 }
 0x8dc   :  { %957 = vmatpush.msrb.mxu1 %v925_v58 }
 0x8df   :  { %v492_v59 = vpop.permute.xlu0 %491  ;;  %v629_v60 = vpop.permute.xlu1 %628 }
 0x8e0   :  { %497 = vst.msk [vmem:[#allocation2 + $0x8] sm:$0xff] %vm495_vm3, %v492_v59  ;;  %v772_v23 = vld [vmem:[#allocation2] sm:$0xff] }
 0x8e1   :  { %634 = vst.msk [vmem:[#allocation2 + $0x8] sm:$0xff] %vm632_vm4, %v629_v60  ;;  %1929 = vmatmul.msk.f32.vlgmr.msrb.gmra.mxu0 %vm132_vm2, %v772_v23  ;;  %v924_v59 = vld [vmem:[%s2993_s15] sm:$0xff] }
 0x8e2   :  { %771 = vst.msk [vmem:[#allocation2 + $0x8] sm:$0xff] %vm769_vm5, %v766_v61  ;;  %958 = vmatpush.msrb.mxu1 %v924_v59  ;;  %v2061_v60 = vld [vmem:[%s2990_s14] ss:$0 sm:$0xff] }
 0x8e9   :  { %v773_v62 = vld [vmem:[#allocation2 + $0x8] sm:$0xff] }
 0x8ea   :  { %1930 = vmatmul.msk.f32.gmra.mxu0 %vm132_vm2, %v773_v62 }
 0x95e   :  { %v805_v0 = vpop.f32.mrf.mxu0 }
 0x95f   :  { %v806_v1 = vadd.f32 %v2058_v63, %v805_v0 }
 0x961   :  { %v811_v2 = vadd.f32 %v806_v1, %v2385_v13 }
 0x963   :  { %v815_v36 = vsel %vm132_vm2, %v811_v2, 0.0 }
 0x964   :  { %816 = vadd.xlane.f32.xlu0 %v815_v36 }
 0x967   :  { %v808_v3 = vpop.f32.mrf.mxu0 }
 0x968   :  { %v809_v4 = vadd.f32 %v2058_v63, %v808_v3 }
 0x96a   :  { %v812_v5 = vadd.f32 %v809_v4, %v2389_v18  ;;  %v872_v18 = vld [vmem:[%s2991_s13 + $0x18] sm:$0xff] }
 0x96b   :  { %895 = vmatpush.msrb.mxu3 %v872_v18  ;;  %v2062_v18 = vld [vmem:[%s2992_s16] ss:$0 sm:$0xff] }
 0x96c   :  { %v818_v6 = vsel %vm132_vm2, %v812_v5, 0.0 }
 0x96d   :  { %819 = vadd.xlane.f32.xlu1 %v818_v6  ;;  %896 = vmatpush.msrb.mxu3 %v871_v17 }
 0x96f   :  { %897 = vmatpush.msrb.mxu3 %v870_v19 }
 0x971   :  { %898 = vmatpush.msrb.mxu3 %v869_v20 }
 0x9d7   :  { %v817_v7 = vpop.xlane.xlu0 %816 }
 0x9d8   :  { %v821_v8 = vmul.f32 %v817_v7, %v2359_v40 }
 0x9da   :  { %v823_v9 = vsub.f32 %v811_v2, %v821_v8 }
 0x9dc   :  { %v825_v10 = vmul.f32 %v823_v9, %v823_v9 }
 0x9de   :  { %v827_v11 = vsel %vm132_vm2, %v825_v10, 0.0 }
 0x9df   :  { %828 = vadd.xlane.f32.xlu2 %v827_v11 }
 0x9e0   :  { %v820_v12 = vpop.xlane.xlu1 %819 }
 0x9e1   :  { %v822_v13 = vmul.f32 %v820_v12, %v2359_v40 }
 0x9e3   :  { %v824_v14 = vsub.f32 %v812_v5, %v822_v13 }
 0x9e5   :  { %v826_v15 = vmul.f32 %v824_v14, %v824_v14 }
 0x9e7   :  { %v830_v16 = vsel %vm132_vm2, %v826_v15, 0.0 }
 0x9e8   :  { %831 = vadd.xlane.f32.xlu0 %v830_v16 }
 0xa52   :  { %v829_v22 = vpop.xlane.xlu2 %828 }
 0xa53   :  { %v833_v24 = vmul.f32 %v829_v22, %v2359_v40 }
 0xa55   :  { %v835_v26 = vadd.f32 1e-12, %v833_v24 }
 0xa57   :  { %2112 = vrsqrt.f32 %v835_v26  ;;  %vm843_vm7 = vweird.f32 %v835_v26 }
 0xa5b   :  { %v832_v28 = vpop.xlane.xlu0 %831 }
 0xa5c   :  { %v834_v29 = vmul.f32 %v832_v28, %v2359_v40 }
 0xa5d   :  { %v2113_v30 = vpop.eup %2112 }
 0xa5e   :  { %v838_v31 = vmul.f32 %v2113_v30, %v835_v26  ;;  %v836_v33 = vadd.f32 1e-12, %v834_v29  ;;  %vm844_vm6 = vweird.f32 %v2113_v30 }
 0xa5f   :  { %vm845_vm8 = vmor %vm843_vm7, %vm844_vm6 }
 0xa60   :  { %v839_v34 = vmul.f32 %v2113_v30, %v838_v31  ;;  %2114 = vrsqrt.f32 %v836_v33  ;;  %vm853_vm12 = vweird.f32 %v836_v33 }
 0xa62   :  { %v840_v35 = vmul.f32 0.5, %v839_v34 }
 0xa64   :  { %v841_v37 = vsub.f32 1.5, %v840_v35 }
 0xa66   :  { %v2115_v38 = vpop.eup %2114  ;;  %v842_v39 = vmul.f32 %v2113_v30, %v841_v37 }
 0xa67   :  { %v848_v43 = vmul.f32 %v2115_v38, %v836_v33  ;;  %vm854_vm9 = vweird.f32 %v2115_v38 }
 0xa68   :  { %v846_v44 = vsel %vm845_vm8, %v2113_v30, %v842_v39  ;;  %vm855_vm13 = vmor %vm853_vm12, %vm854_vm9 }
 0xa69   :  { %v857_v45 = vmul.f32 %v846_v44, %v823_v9  ;;  %v849_v46 = vmul.f32 %v2115_v38, %v848_v43  ;;  %v1938_v44 = vld [vmem:[%s2984_s7 + $0x38] sm:$0xff] }
 0xa6a   :  { %1052 = vmatpush.msrb.mxu2 %v1938_v44 }
 0xa6b   :  { %v862_v32 = vmul.f32 %v2059_v41, %v857_v45  ;;  %v850_v48 = vmul.f32 0.5, %v849_v46  ;;  %v1937_v45 = vld [vmem:[%s2984_s7 + $0x30] sm:$0xff]  ;;  %v1936_v46 = vld [vmem:[%s2984_s7 + $0x28] sm:$0xff] }
 0xa6c   :  { %1053 = vmatpush.msrb.mxu2 %v1937_v45 }
 0xa6d   :  { %v851_v21 = vsub.f32 1.5, %v850_v48  ;;  %v867_v49 = vadd.f32 %v2060_v47, %v862_v32 }
 0xa6e   :  { %1054 = vmatpush.msrb.mxu2 %v1936_v46 }
 0xa6f   :  { %v852_v42 = vmul.f32 %v2115_v38, %v851_v21  ;;  %1931 = vmatmul.msk.f32.vlgmr.msrb.gmra.mxu3 %vm132_vm2, %v867_v49 }
 0xa71   :  { %v856_v50 = vsel %vm855_vm13, %v2115_v38, %v852_v42 }
 0xa72   :  { %v858_v51 = vmul.f32 %v856_v50, %v824_v14 }
 0xa74   :  { %v863_v52 = vmul.f32 %v2059_v41, %v858_v51 }
 0xa76   :  { %v868_v53 = vadd.f32 %v2060_v47, %v863_v52  ;;  %v1935_v47 = vld [vmem:[%s2984_s7 + $0x20] sm:$0xff]  ;;  %s3039_s7 = smov 24  }
 0xa77   :  { %1055 = vmatpush.msrb.mxu2 %v1935_v47 }
 0xa78   :  { %1932 = vmatmul.msk.f32.gmra.mxu3 %vm132_vm2, %v868_v53 }
 0xaf2   :  { %v900_v23 = vpop.f32.mrf.mxu3 }
 0xaf3   :  { %v901_v61 = vadd.f32 %v2061_v60, %v900_v23  ;;  %v2064_v23 = vld [vmem:[%s2995_s18] ss:$0 sm:$0xff] }
 0xaf5   :  { %v908_v62 = vmul.f32 0.044715, %v901_v61  ;;  %v906_v9 = vmul.f32 0.5, %v901_v61 }
 0xaf7   :  { %v910_v63 = vmul.f32 %v908_v62, %v901_v61 }
 0xaf9   :  { %v912_v0 = vmul.f32 %v910_v63, %v901_v61 }
 0xafb   :  { %v914_v1 = vadd.f32 %v912_v0, %v901_v61  ;;  %v903_v2 = vpop.f32.mrf.mxu3 }
 0xafc   :  { %v904_v36 = vadd.f32 %v2061_v60, %v903_v2 }
 0xafd   :  { %v916_v3 = vmul.f32 0.7978846, %v914_v1 }
 0xafe   :  { %v909_v4 = vmul.f32 0.044715, %v904_v36  ;;  %v907_v14 = vmul.f32 0.5, %v904_v36 }
 0xaff   :  { %2116 = vtanh.f32 %v916_v3 }
 0xb00   :  { %v911_v5 = vmul.f32 %v909_v4, %v904_v36 }
 0xb02   :  { %v913_v6 = vmul.f32 %v911_v5, %v904_v36  ;;  %v2065_v5 = vld [vmem:[%s2983_s8 + $0x1] ss:$0 sm:$0xff]  ;;  %s3027_s8 = smov 112  }
 0xb04   :  { %v915_v7 = vadd.f32 %v913_v6, %v904_v36 }
 0xb05   :  { %v2117_v8 = vpop.eup %2116 }
 0xb06   :  { %v920_v10 = vadd.f32 1.0, %v2117_v8  ;;  %v917_v11 = vmul.f32 0.7978846, %v915_v7 }
 0xb08   :  { %v922_v12 = vmul.f32 %v920_v10, %v906_v9  ;;  %2118 = vtanh.f32 %v917_v11 }
 0xb0a   :  { %1933 = vmatmul.msk.f32.vlgmr.msrb.gmra.mxu1 %vm936_vm14, %v922_v12 }
 0xb0e   :  { %v2119_v13 = vpop.eup %2118 }
 0xb0f   :  { %v921_v15 = vadd.f32 1.0, %v2119_v13 }
 0xb11   :  { %v923_v16 = vmul.f32 %v921_v15, %v907_v14 }
 0xb13   :  { %1934 = vmatmul.msk.f32.gmra.mxu1 %vm936_vm14, %v923_v16 }
 0xb87   :  { %v960_v17 = vpop.f32.mrf.mxu1 }
 0xb88   :  { %v961_v19 = vadd.f32 %v2062_v18, %v960_v17 }
 0xb8a   :  { %v966_v20 = vadd.f32 %v961_v19, %v867_v49 }
 0xb8c   :  { %v970_v22 = vsel %vm132_vm2, %v966_v20, 0.0 }
 0xb8d   :  { %971 = vadd.xlane.f32.xlu1 %v970_v22 }
 0xb90   :  { %v963_v24 = vpop.f32.mrf.mxu1 }
 0xb91   :  { %v964_v26 = vadd.f32 %v2062_v18, %v963_v24 }
 0xb93   :  { %v967_v28 = vadd.f32 %v964_v26, %v868_v53 }
 0xb95   :  { %v973_v29 = vsel %vm132_vm2, %v967_v28, 0.0 }
 0xb96   :  { %974 = vadd.xlane.f32.xlu2 %v973_v29 }
 0xc00   :  { %v972_v30 = vpop.xlane.xlu1 %971 }
 0xc01   :  { %v976_v31 = vmul.f32 %v972_v30, %v2359_v40  ;;  %v2168_v30 = vld [vmem:[%s2985_s1] sm:$0xff] }
 0xc03   :  { %v978_v33 = vsub.f32 %v966_v20, %v976_v31 }
 0xc05   :  { %v980_v34 = vmul.f32 %v978_v33, %v978_v33 }
 0xc07   :  { %v982_v35 = vsel %vm132_vm2, %v980_v34, 0.0 }
 0xc08   :  { %983 = vadd.xlane.f32.xlu0 %v982_v35 }
 0xc09   :  { %v975_v37 = vpop.xlane.xlu2 %974 }
 0xc0a   :  { %v977_v38 = vmul.f32 %v975_v37, %v2359_v40  ;;  %v2169_v37 = vld [vmem:[%s2985_s1 + $0x8] sm:$0xff]  ;;  %s3029_s1 = smov 64  }
 0xc0c   :  { %v979_v39 = vsub.f32 %v967_v28, %v977_v38 }
 0xc0e   :  { %v981_v41 = vmul.f32 %v979_v39, %v979_v39 }
 0xc10   :  { %v985_v43 = vsel %vm132_vm2, %v981_v41, 0.0 }
 0xc11   :  { %986 = vadd.xlane.f32.xlu1 %v985_v43 }
 0xc7b   :  { %v984_v32 = vpop.xlane.xlu0 %983 }
 0xc7c   :  { %v988_v48 = vmul.f32 %v984_v32, %v2359_v40 }
 0xc7e   :  { %v990_v21 = vadd.f32 1e-12, %v988_v48 }
 0xc80   :  { %2120 = vrsqrt.f32 %v990_v21  ;;  %vm998_vm0 = vweird.f32 %v990_v21 }
 0xc84   :  { %v987_v49 = vpop.xlane.xlu1 %986 }
 0xc85   :  { %v989_v42 = vmul.f32 %v987_v49, %v2359_v40 }
 0xc86   :  { %v2121_v50 = vpop.eup %2120 }
 0xc87   :  { %v993_v51 = vmul.f32 %v2121_v50, %v990_v21  ;;  %v991_v52 = vadd.f32 1e-12, %v989_v42  ;;  %vm999_vm15 = vweird.f32 %v2121_v50 }
 0xc88   :  { %vm1000_vm1 = vmor %vm998_vm0, %vm999_vm15 }
 0xc89   :  { %v994_v53 = vmul.f32 %v2121_v50, %v993_v51  ;;  %2122 = vrsqrt.f32 %v991_v52  ;;  %vm1008_vm7 = vweird.f32 %v991_v52 }
 0xc8b   :  { %v995_v54 = vmul.f32 0.5, %v994_v53 }
 0xc8d   :  { %v996_v27 = vsub.f32 1.5, %v995_v54 }
 0xc8f   :  { %v2123_v55 = vpop.eup %2122  ;;  %v997_v56 = vmul.f32 %v2121_v50, %v996_v27 }
 0xc90   :  { %v1003_v57 = vmul.f32 %v2123_v55, %v991_v52  ;;  %vm1009_vm6 = vweird.f32 %v2123_v55 }
 0xc91   :  { %v1001_v58 = vsel %vm1000_vm1, %v2121_v50, %v997_v56  ;;  %vm1010_vm8 = vmor %vm1008_vm7, %vm1009_vm6 }
 0xc92   :  { %v1012_v59 = vmul.f32 %v1001_v58, %v978_v33  ;;  %v1004_v60 = vmul.f32 %v2123_v55, %v1003_v57 }
 0xc94   :  { %v1017_v61 = vmul.f32 %v2063_v25, %v1012_v59  ;;  %v1005_v62 = vmul.f32 0.5, %v1004_v60 }
 0xc96   :  { %v1006_v63 = vsub.f32 1.5, %v1005_v62  ;;  %v2648_v0 = vadd.f32 %v2064_v23, %v1017_v61 }
 0xc98   :  { %v1007_v1 = vmul.f32 %v2123_v55, %v1006_v63  ;;  %1940 = vmatmul.msk.f32.vlgmr.msrb.gmra.mxu2 %vm132_vm2, %v2648_v0 }
 0xc9a   :  { %v1011_v2 = vsel %vm1010_vm8, %v2123_v55, %v1007_v1 }
 0xc9b   :  { %v1013_v36 = vmul.f32 %v1011_v2, %v979_v39 }
 0xc9d   :  { %v1018_v3 = vmul.f32 %v2063_v25, %v1013_v36 }
 0xc9f   :  { %v2652_v4 = vadd.f32 %v2064_v23, %v1018_v3 }
 0xca1   :  { %1941 = vmatmul.msk.f32.gmra.mxu2 %vm132_vm2, %v2652_v4 }
 0xd1b   :  { %v1057_v6 = vpop.f32.mrf.mxu2 }
 0xd1c   :  { %v2659_v7 = vadd.f32 %v2065_v5, %v1057_v6 }
 0xd1e   :  { %1193 = vrot.lane.b32.xlu0 %v2659_v7, %s2174_s27  ;;  %1065 = vrot.lane.b32.xlu1 %v2659_v7, %s2173_s25 }
 0xd24   :  { %v1060_v8 = vpop.f32.mrf.mxu2 }
 0xd25   :  { %v2665_v9 = vadd.f32 %v2065_v5, %v1060_v8 }
 0xd27   :  { %1331 = vrot.lane.b32.xlu1 %v2665_v9, %s2178_s22  ;;  %1195 = vrot.lane.b32.xlu0 %v2665_v9, %s2174_s27  ;;  %s3028_s27 = smov 104   ;;  %v2725_v23 = vpack.i.bf16 %v2659_v7, %v2665_v9 }
 0xd28   :  { %1067 = vrot.lane.b32.xlu2 %v2665_v9, %s2173_s25 }
 0xd2f   :  { %1465 = vrot.lane.b32.xlu1 %v2659_v7, %s2180_s2  ;;  %1329 = vrot.lane.b32.xlu0 %v2659_v7, %s2178_s22 }
 0xd30   :  { %1189 = vrot.lane.b32.xlu2 %v2659_v7, %s2175_s3 }
 0xd37   :  { %1327 = vrot.lane.b32.xlu1 %v2665_v9, %s3027_s8  ;;  %1191 = vrot.lane.b32.xlu0 %v2665_v9, %s2175_s3 }
 0xd38   :  { %1467 = vrot.lane.b32.xlu2 %v2665_v9, %s2180_s2 }
 0xd3f   :  { %1461 = vrot.lane.b32.xlu0 %v2659_v7, %s3028_s27 }
 0xd40   :  { %1325 = vrot.lane.b32.xlu2 %v2659_v7, %s3027_s8 }
 0xd48   :  { %1463 = vrot.lane.b32.xlu2 %v2665_v9, %s3028_s27 }
 0xd82   :  { %v1068_v10 = vpop.permute.xlu2 %1067 }
 0xd83   :  { %1942 = vmatpush.xpose.msk.msra.mxu0 %vm239_vm10, %v1068_v10 }
 0xd8a   :  { %v1190_v11 = vpop.permute.xlu2 %1189 }
 0xd90   :  { %v1194_v12 = vpop.permute.xlu0 %1193  ;;  %v1066_v13 = vpop.permute.xlu1 %1065 }
 0xd91   :  { %1943 = vmatpush.xpose.msk.msra.mxu0 %vm239_vm10, %v1066_v13 }
 0xd92   :  { %v1468_v16 = vpop.permute.xlu2 %1467 }
 0xd94   :  { %1944 = vmatmul.msk.f32.vlgmr.msra.gmra.mxu0 %vm239_vm10, %v2659_v7 }
 0xd99   :  { %v1196_v14 = vpop.permute.xlu0 %1195  ;;  %v1332_v15 = vpop.permute.xlu1 %1331 }
 0xd9a   :  { %1948 = vmatpush.xpose.msk.msra.mxu1 %vm239_vm10, %v1196_v14  ;;  %1954 = vmatpush.xpose.msk.msrb.mxu0 %vm239_vm10, %v1332_v15  ;;  %v1326_v19 = vpop.permute.xlu2 %1325 }
 0xd9c   :  { %1945 = vmatmul.msk.f32.gmra.mxu0 %vm239_vm10, %v2665_v9 }
 0xd9e   :  { %1949 = vmatpush.xpose.msk.msra.mxu1 %vm239_vm10, %v1194_v12 }
 0xda1   :  { %v1330_v18 = vpop.permute.xlu0 %1329  ;;  %1950 = vmatmul.msk.f32.vlgmr.msra.gmra.mxu1 %vm239_vm10, %v1190_v11  ;;  %v1466_v17 = vpop.permute.xlu1 %1465 }
 0xda2   :  { %1960 = vmatpush.xpose.msk.msrb.mxu1 %vm239_vm10, %v1468_v16  ;;  %1955 = vmatpush.xpose.msk.msrb.mxu0 %vm239_vm10, %v1330_v18  ;;  %v1464_v26 = vpop.permute.xlu2 %1463 }
 0xda5   :  { %1956 = vmatmul.msk.f32.vlgmr.msrb.gmra.mxu0 %vm239_vm10, %v1326_v19 }
 0xda6   :  { %1961 = vmatpush.xpose.msk.msrb.mxu1 %vm239_vm10, %v1466_v17 }
 0xda9   :  { %v1192_v20 = vpop.permute.xlu0 %1191  ;;  %v1328_v22 = vpop.permute.xlu1 %1327 }
 0xdaa   :  { %1951 = vmatmul.msk.f32.gmra.mxu1 %vm239_vm10, %v1192_v20 }
 0xdad   :  { %1957 = vmatmul.msk.f32.gmra.mxu0 %vm239_vm10, %v1328_v22 }
 0xdb1   :  { %v1462_v24 = vpop.permute.xlu0 %1461 }
 0xdb2   :  { %1962 = vmatmul.msk.f32.vlgmr.msrb.gmra.mxu1 %vm239_vm10, %v1462_v24 }
 0xdba   :  { %1963 = vmatmul.msk.f32.gmra.mxu1 %vm239_vm10, %v1464_v26 }
 0xe11   :  { %v1094_v28 = vpop.f32.mrf.mxu0 }
 0xe12   :  { %v1100_v29 = vmul.f32 0.35355338, %v1094_v28 }
 0xe14   :  { %v1102_v31 = vadd.f32 %v2168_v30, %v1100_v29 }
 0xe16   :  { %v1104_v33 = vsel %vm275_vm11, %v1102_v31, -inf }
 0xe17   :  { %1105 = vmax.xlane.f32.xlu0 %v1104_v33 }
 0xe19   :  { %v1097_v34 = vpop.f32.mrf.mxu0 }
 0xe1a   :  { %v1101_v35 = vmul.f32 0.35355338, %v1097_v34 }
 0xe1c   :  { %v1103_v38 = vadd.f32 %v2169_v37, %v1101_v35 }
 0xe1e   :  { %v1222_v39 = vpop.f32.mrf.mxu1  ;;  %v1107_v41 = vsel %vm275_vm11, %v1103_v38, -inf }
 0xe1f   :  { %v1228_v43 = vmul.f32 0.35355338, %v1222_v39  ;;  %1108 = vmax.xlane.f32.xlu2 %v1107_v41 }
 0xe21   :  { %v1230_v44 = vadd.f32 %v2168_v30, %v1228_v43 }
 0xe22   :  { %v1358_v45 = vpop.f32.mrf.mxu0 }
 0xe23   :  { %v1364_v46 = vmul.f32 0.35355338, %v1358_v45  ;;  %v1232_v47 = vsel %vm275_vm11, %v1230_v44, -inf }
 0xe24   :  { %1233 = vmax.xlane.f32.xlu1 %v1232_v47 }
 0xe25   :  { %v1366_v48 = vadd.f32 %v2168_v30, %v1364_v46 }
 0xe27   :  { %v1225_v32 = vpop.f32.mrf.mxu1  ;;  %v1368_v50 = vsel %vm275_vm11, %v1366_v48, -inf }
 0xe28   :  { %v1229_v21 = vmul.f32 0.35355338, %v1225_v32 }
 0xe2a   :  { %v1361_v49 = vpop.f32.mrf.mxu0  ;;  %v1231_v42 = vadd.f32 %v2169_v37, %v1229_v21 }
 0xe2b   :  { %v1365_v51 = vmul.f32 0.35355338, %v1361_v49 }
 0xe2c   :  { %1369 = vmax.xlane.f32.xlu1 %v1368_v50  ;;  %v1235_v52 = vsel %vm275_vm11, %v1231_v42, -inf }
 0xe2d   :  { %1236 = vmax.xlane.f32.xlu0 %v1235_v52  ;;  %v1367_v27 = vadd.f32 %v2169_v37, %v1365_v51 }
 0xe2f   :  { %v1494_v53 = vpop.f32.mrf.mxu1  ;;  %v1371_v25 = vsel %vm275_vm11, %v1367_v27, -inf }
 0xe30   :  { %v1500_v54 = vmul.f32 0.35355338, %v1494_v53 }
 0xe32   :  { %v1502_v55 = vadd.f32 %v2168_v30, %v1500_v54 }
 0xe34   :  { %v1504_v56 = vsel %vm275_vm11, %v1502_v55, -inf }
 0xe35   :  { %1505 = vmax.xlane.f32.xlu2 %v1504_v56  ;;  %1372 = vmax.xlane.f32.xlu0 %v1371_v25 }
 0xe37   :  { %v1497_v57 = vpop.f32.mrf.mxu1 }
 0xe38   :  { %v1501_v58 = vmul.f32 0.35355338, %v1497_v57 }
 0xe3a   :  { %v1503_v59 = vadd.f32 %v2169_v37, %v1501_v58 }
 0xe3c   :  { %v1507_v60 = vsel %vm275_vm11, %v1503_v59, -inf }
 0xe3d   :  { %1508 = vmax.xlane.f32.xlu1 %v1507_v60 }
 0xe56   :  { %2035 = vrot.lane.b32.xlu1 %v2725_v23, %s3029_s1 }
 0xe8a   :  { %v1106_v61 = vpop.xlane.xlu0 %1105 }
 0xe8b   :  { %v1110_v62 = vsub.f32 %v1102_v31, %v1106_v61 }
 0xe8d   :  { %v1112_v63 = vmul.f32 1.442695, %v1110_v62 }
 0xe8f   :  { %2124 = vpow2.f32 %v1112_v63 }
 0xe92   :  { %v1109_v1 = vpop.xlane.xlu2 %1108 }
 0xe93   :  { %v1111_v2 = vsub.f32 %v1103_v38, %v1109_v1 }
 0xe95   :  { %v2729_v36 = vpop.eup %2124  ;;  %v1114_v3 = vmul.f32 1.442695, %v1111_v2 }
 0xe96   :  { %v1116_v5 = vsel %vm275_vm11, %v2729_v36, 0.0 }
 0xe97   :  { %2126 = vpow2.f32 %v1114_v3  ;;  %1117 = vadd.xlane.f32.xlu2 %v1116_v5  ;;  %v1234_v6 = vpop.xlane.xlu1 %1233 }
 0xe98   :  { %v1238_v7 = vsub.f32 %v1230_v44, %v1234_v6 }
 0xe9a   :  { %v1240_v8 = vmul.f32 1.442695, %v1238_v7 }
 0xe9c   :  { %2128 = vpow2.f32 %v1240_v8 }
 0xe9d   :  { %v2733_v9 = vpop.eup %2126 }
 0xe9e   :  { %v1119_v10 = vsel %vm275_vm11, %v2733_v9, 0.0 }
 0xe9f   :  { %1120 = vadd.xlane.f32.xlu1 %v1119_v10  ;;  %v1370_v11 = vpop.xlane.xlu1 %1369 }
 0xea0   :  { %v1374_v12 = vsub.f32 %v1366_v48, %v1370_v11  ;;  %v1237_v13 = vpop.xlane.xlu0 %1236 }
 0xea1   :  { %v1239_v14 = vsub.f32 %v1231_v42, %v1237_v13 }
 0xea2   :  { %v2737_v15 = vpop.eup %2128  ;;  %v1376_v16 = vmul.f32 1.442695, %v1374_v12 }
 0xea3   :  { %v1242_v18 = vmul.f32 1.442695, %v1239_v14  ;;  %v1244_v17 = vsel %vm275_vm11, %v2737_v15, 0.0 }
 0xea4   :  { %2130 = vpow2.f32 %v1376_v16  ;;  %1245 = vadd.xlane.f32.xlu0 %v1244_v17 }
 0xea5   :  { %2132 = vpow2.f32 %v1242_v18 }
 0xea8   :  { %v1506_v19 = vpop.xlane.xlu2 %1505  ;;  %v1373_v20 = vpop.xlane.xlu0 %1372 }
 0xea9   :  { %v1510_v22 = vsub.f32 %v1502_v55, %v1506_v19  ;;  %v1375_v29 = vsub.f32 %v1367_v27, %v1373_v20 }
 0xeaa   :  { %v2741_v24 = vpop.eup %2130 }
 0xeab   :  { %v2743_v26 = vpop.eup %2132  ;;  %v1512_v28 = vmul.f32 1.442695, %v1510_v22  ;;  %v1380_v30 = vsel %vm275_vm11, %v2741_v24, 0.0  ;;  %v1378_v33 = vmul.f32 1.442695, %v1375_v29 }
 0xeac   :  { %1381 = vadd.xlane.f32.xlu0 %v1380_v30  ;;  %v1247_v31 = vsel %vm275_vm11, %v2743_v26, 0.0 }
 0xead   :  { %2134 = vpow2.f32 %v1512_v28  ;;  %1248 = vadd.xlane.f32.xlu2 %v1247_v31 }
 0xeae   :  { %2136 = vpow2.f32 %v1378_v33 }
 0xeb0   :  { %v1509_v34 = vpop.xlane.xlu1 %1508 }
 0xeb1   :  { %v1511_v37 = vsub.f32 %v1503_v59, %v1509_v34 }
 0xeb3   :  { %v2749_v35 = vpop.eup %2134  ;;  %v1514_v39 = vmul.f32 1.442695, %v1511_v37 }
 0xeb4   :  { %v1516_v38 = vsel %vm275_vm11, %v2749_v35, 0.0  ;;  %v2755_v41 = vpop.eup %2136 }
 0xeb5   :  { %1517 = vadd.xlane.f32.xlu2 %v1516_v38  ;;  %2138 = vpow2.f32 %v1514_v39  ;;  %v1383_v43 = vsel %vm275_vm11, %v2755_v41, 0.0 }
 0xeb8   :  { %2050 = vrot.lane.b32.xlu1 %v2725_v23, %s3030_s6 }
 0xebb   :  { %v2761_v44 = vpop.eup %2138 }
 0xebc   :  { %v1519_v45 = vsel %vm275_vm11, %v2761_v44, 0.0 }
 0xebd   :  { %1384 = vadd.xlane.f32.xlu2 %v1383_v43 }
 0xec0   :  { %2040 = vrot.lane.b32.xlu0 %v2725_v23, %s3031_s23 }
 0xec5   :  { %1520 = vadd.xlane.f32.xlu2 %v1519_v45 }
 0xec8   :  { %v2036_v46 = vpop.permute.xlu1 %2035 }
 0xec9   :  { %v2037_v47 = vunpack.i.l.bf16 %v2036_v46  ;;  %v2038_v32 = vunpack.i.h.bf16 %v2036_v46 }
 0xecb   :  { %1178 = vmatpush.msra.mxu3 %v2037_v47 }
 0xecd   :  { %1179 = vmatpush.msra.mxu3 %v2038_v32 }
 0xedd   :  { %2045 = vrot.lane.b32.xlu2 %v2725_v23, %s3032_s24 }
 0xf0a   :  { %v1118_v48 = vpop.xlane.xlu2 %1117 }
 0xf0b   :  { %2140 = vrcp.f32 %v1118_v48  ;;  %v1133_v51 = vand.u32 2147483648, %v1118_v48  ;;  %v1131_v53 = vand.u32 2147483647, %v1118_v48  ;;  %vm1127_vm12 = vweird.f32 %v1118_v48 }
 0xf0d   :  { %v1134_v56 = vor.u32 1.1754944e-38, %v1133_v51  ;;  %vm1132_vm15 = vcmp.eq.f32.partialorder %v1131_v53, 8.507059e+37 }
 0xf11   :  { %v2141_v21 = vpop.eup %2140 }
 0xf12   :  { %v1123_v49 = vmul.f32 %v2141_v21, %v1118_v48  ;;  %v1121_v42 = vpop.xlane.xlu1 %1120  ;;  %vm1128_vm9 = vweird.f32 %v2141_v21 }
 0xf13   :  { %2142 = vrcp.f32 %v1121_v42  ;;  %vm1129_vm13 = vmor %vm1127_vm12, %vm1128_vm9  ;;  %v1148_v62 = vand.u32 2147483648, %v1121_v42  ;;  %v1146_v2 = vand.u32 2147483647, %v1121_v42  ;;  %vm1142_vm1 = vweird.f32 %v1121_v42 }
 0xf14   :  { %v1124_v50 = vsub.f32 1.0, %v1123_v49 }
 0xf15   :  { %v1149_v6 = vor.u32 1.1754944e-38, %v1148_v62  ;;  %vm1147_vm7 = vcmp.eq.f32.partialorder %v1146_v2, 8.507059e+37 }
 0xf16   :  { %v1125_v52 = vmul.f32 %v2141_v21, %v1124_v50 }
 0xf17   :  { %v1246_v54 = vpop.xlane.xlu0 %1245 }
 0xf18   :  { %v1126_v27 = vadd.f32 %v2141_v21, %v1125_v52  ;;  %2144 = vrcp.f32 %v1246_v54  ;;  %v1261_v19 = vand.u32 2147483648, %v1246_v54  ;;  %vm1255_vm9 = vweird.f32 %v1246_v54 }
 0xf19   :  { %v2143_v55 = vpop.eup %2142  ;;  %v1259_v20 = vand.u32 2147483647, %v1246_v54 }
 0xf1a   :  { %v1130_v25 = vsel %vm1129_vm13, %v2141_v21, %v1126_v27  ;;  %v1138_v57 = vmul.f32 %v2143_v55, %v1121_v42  ;;  %vm1143_vm0 = vweird.f32 %v2143_v55  ;;  %v1262_v33 = vor.u32 1.1754944e-38, %v1261_v19 }
 0xf1b   :  { %v1135_v58 = vsel %vm1132_vm15, %v1134_v56, %v1130_v25  ;;  %vm1144_vm6 = vmor %vm1142_vm1, %vm1143_vm0  ;;  %vm1260_vm13 = vcmp.eq.f32.partialorder %v1259_v20, 8.507059e+37 }
 0xf1c   :  { %v1139_v59 = vsub.f32 1.0, %v1138_v57  ;;  %v1136_v60 = vmul.f32 %v2729_v36, %v1135_v58 }
 0xf1e   :  { %v2145_v23 = vpop.eup %2144  ;;  %v1140_v61 = vmul.f32 %v2143_v55, %v1139_v59  ;;  %1946 = vmatmul.msk.f32.vlgmr.msra.gmra.mxu3 %vm275_vm11, %v1136_v60 }
 0xf1f   :  { %v1251_v63 = vmul.f32 %v2145_v23, %v1246_v54  ;;  %v2772_v3 = vpop.xlane.xlu0 %1381  ;;  %vm1256_vm8 = vweird.f32 %v2145_v23 }
 0xf20   :  { %v2769_v1 = vpop.xlane.xlu2 %1248  ;;  %v1141_v5 = vadd.f32 %v2143_v55, %v1140_v61  ;;  %vm1257_vm12 = vmor %vm1255_vm9, %vm1256_vm8  ;;  %v1397_v57 = vand.u32 2147483648, %v2772_v3  ;;  %vm1391_vm8 = vweird.f32 %v2772_v3  ;;  %v1395_v59 = vand.u32 2147483647, %v2772_v3 }
 0xf21   :  { %2146 = vrcp.f32 %v2769_v1  ;;  %v1252_v7 = vsub.f32 1.0, %v1251_v63  ;;  %v1276_v47 = vand.u32 2147483648, %v2769_v1  ;;  %vm1270_vm0 = vweird.f32 %v2769_v1 }
 0xf22   :  { %v1145_v36 = vsel %vm1144_vm6, %v2143_v55, %v1141_v5  ;;  %2148 = vrcp.f32 %v2772_v3  ;;  %v1274_v49 = vand.u32 2147483647, %v2769_v1  ;;  %v1398_v5 = vor.u32 1.1754944e-38, %v1397_v57 }
 0xf23   :  { %v1150_v8 = vsel %vm1147_vm7, %v1149_v6, %v1145_v36  ;;  %v1253_v12 = vmul.f32 %v2145_v23, %v1252_v7  ;;  %v1277_v27 = vor.u32 1.1754944e-38, %v1276_v47 }
 0xf24   :  { %v1151_v10 = vmul.f32 %v2733_v9, %v1150_v8  ;;  %vm1275_vm7 = vcmp.eq.f32.partialorder %v1274_v49, 8.507059e+37  ;;  %v1966_v49 = vld [vmem:[%s2987_s9 + $0x20] sm:$0xff] }
 0xf25   :  { %v1254_v18 = vadd.f32 %v2145_v23, %v1253_v12 }
 0xf26   :  { %1947 = vmatmul.msk.f32.gmra.mxu3 %vm275_vm11, %v1151_v10 }
 0xf27   :  { %v2147_v11 = vpop.eup %2146  ;;  %v1258_v28 = vsel %vm1257_vm12, %v2145_v23, %v1254_v18 }
 0xf28   :  { %v1266_v13 = vmul.f32 %v2147_v11, %v2769_v1  ;;  %v2778_v14 = vpop.xlane.xlu2 %1517  ;;  %v2781_v16 = vpop.eup %2148  ;;  %v1263_v38 = vsel %vm1260_vm13, %v1262_v33, %v1258_v28  ;;  %vm1271_vm15 = vweird.f32 %v2147_v11 }
 0xf29   :  { %2150 = vrcp.f32 %v2778_v14  ;;  %v1387_v9 = vmul.f32 %v2781_v16, %v2772_v3  ;;  %v1264_v21 = vmul.f32 %v2737_v15, %v1263_v38  ;;  %vm2799_vm1 = vmor %vm1270_vm0, %vm1271_vm15  ;;  %vm1392_vm6 = vweird.f32 %v2781_v16 }
 0xf2a   :  { %v1267_v17 = vsub.f32 1.0, %v1266_v13  ;;  %v2051_v45 = vpop.permute.xlu1 %2050  ;;  %vm2819_vm12 = vmor %vm1391_vm8, %vm1392_vm6  ;;  %vm1527_vm13 = vweird.f32 %v2778_v14  ;;  %v1533_v61 = vand.u32 2147483648, %v2778_v14  ;;  %v1531_v63 = vand.u32 2147483647, %v2778_v14 }
 0xf2b   :  { %v1388_v34 = vsub.f32 1.0, %v1387_v9  ;;  %v2052_v50 = vunpack.i.l.bf16 %v2051_v45  ;;  %v2053_v55 = vunpack.i.h.bf16 %v2051_v45  ;;  %vm1396_vm0 = vcmp.eq.f32.partialorder %v1395_v59, 8.507059e+37 }
 0xf2c   :  { %v1268_v29 = vmul.f32 %v2147_v11, %v1267_v17  ;;  %v1534_v10 = vor.u32 1.1754944e-38, %v1533_v61 }
 0xf2d   :  { %v1389_v48 = vmul.f32 %v2781_v16, %v1388_v34 }
 0xf2e   :  { %v1269_v46 = vadd.f32 %v2147_v11, %v1268_v29 }
 0xf2f   :  { %v2785_v22 = vpop.eup %2150  ;;  %v1390_v56 = vadd.f32 %v2781_v16, %v1389_v48  ;;  %v1968_v48 = vld [vmem:[%s2987_s9 + $0x30] sm:$0xff] }
 0xf30   :  { %v1523_v30 = vmul.f32 %v2785_v22, %v2778_v14  ;;  %v2789_v31 = vpop.xlane.xlu2 %1384  ;;  %v1273_v15 = vsel %vm2799_vm1, %v2147_v11, %v1269_v46  ;;  %vm1528_vm9 = vweird.f32 %v2785_v22  ;;  %vm1532_vm1 = vcmp.eq.f32.partialorder %v1531_v63, 8.507059e+37 }
 0xf31   :  { %2152 = vrcp.f32 %v2789_v31  ;;  %v1278_v58 = vsel %vm1275_vm7, %v1277_v27, %v1273_v15  ;;  %v1394_v62 = vsel %vm2819_vm12, %v2781_v16, %v1390_v56  ;;  %vm1529_vm15 = vmor %vm1527_vm13, %vm1528_vm9  ;;  %vm1406_vm7 = vweird.f32 %v2789_v31 }
 0xf32   :  { %v2041_v37 = vpop.permute.xlu0 %2040  ;;  %v1524_v43 = vsub.f32 1.0, %v1523_v30  ;;  %v1279_v2 = vmul.f32 %v2743_v26, %v1278_v58  ;;  %v1399_v8 = vsel %vm1396_vm0, %v1398_v5, %v1394_v62  ;;  %v1412_v14 = vand.u32 2147483648, %v2789_v31 }
 0xf33   :  { %v2042_v39 = vunpack.i.l.bf16 %v2041_v37  ;;  %v2043_v32 = vunpack.i.h.bf16 %v2041_v37  ;;  %v1400_v17 = vmul.f32 %v2741_v24, %v1399_v8  ;;  %v1410_v19 = vand.u32 2147483647, %v2789_v31  ;;  %v1977_v8 = vld [vmem:[%s2991_s13 + $0x30] sm:$0xff] }
 0xf34   :  { %v1525_v52 = vmul.f32 %v2785_v22, %v1524_v43  ;;  %v1413_v30 = vor.u32 1.1754944e-38, %v1412_v14 }
 0xf35   :  { %1306 = vmatpush.msra.mxu2 %v2042_v39 }
 0xf36   :  { %v1526_v60 = vadd.f32 %v2785_v22, %v1525_v52 }
 0xf37   :  { %v2797_v42 = vpop.eup %2152  ;;  %1307 = vmatpush.msra.mxu2 %v2043_v32  ;;  %v1969_v32 = vld [vmem:[%s2987_s9 + $0x38] sm:$0xff] }
 0xf38   :  { %v1402_v53 = vmul.f32 %v2797_v42, %v2789_v31  ;;  %1952 = vmatmul.msk.f32.vlgmr.msra.gmra.mxu2 %vm275_vm11, %v1264_v21  ;;  %v2807_v54 = vpop.xlane.xlu2 %1520  ;;  %v1530_v6 = vsel %vm1529_vm15, %v2785_v22, %v1526_v60  ;;  %vm1407_vm6 = vweird.f32 %v2797_v42  ;;  %vm1411_vm15 = vcmp.eq.f32.partialorder %v1410_v19, 8.507059e+37  ;;  %1627 = vmatpush.msra.mxu0 %v1969_v32  ;;  %v1967_v21 = vld [vmem:[%s2987_s9 + $0x28] sm:$0xff]  ;;  %v1989_v32 = vld [vmem:[%s2993_s15 + $0x78] sm:$0xff] }
 0xf39   :  { %2154 = vrcp.f32 %v2807_v54  ;;  %1578 = vmatpush.msrb.mxu2 %v2052_v50  ;;  %v1535_v26 = vsel %vm1532_vm1, %v1534_v10, %v1530_v6  ;;  %vm1542_vm9 = vweird.f32 %v2807_v54  ;;  %v1548_v20 = vand.u32 2147483648, %v2807_v54  ;;  %vm1408_vm12 = vmor %vm1406_vm7, %vm1407_vm6  ;;  %v1976_v10 = vld [vmem:[%s2991_s13 + $0x28] sm:$0xff]  ;;  %1783 = vmatpush.msra.mxu1 %v1989_v32 }
 0xf3a   :  { %v1403_v25 = vsub.f32 1.0, %v1402_v53  ;;  %v1536_v9 = vmul.f32 %v2749_v35, %v1535_v26  ;;  %v1546_v29 = vand.u32 2147483647, %v2807_v54  ;;  %1628 = vmatpush.msra.mxu0 %v1968_v48  ;;  %v1988_v48 = vld [vmem:[%s2993_s15 + $0x70] sm:$0xff] }
 0xf3b   :  { %1579 = vmatpush.msrb.mxu2 %v2053_v55  ;;  %v1549_v31 = vor.u32 1.1754944e-38, %v1548_v20  ;;  %v2066_v55 = vld [vmem:[%s2986_s10 + $0x1] ss:$0 sm:$0xff]  ;;  %1784 = vmatpush.msra.mxu1 %v1988_v48 }
 0xf3c   :  { %v1404_v1 = vmul.f32 %v2797_v42, %v1403_v25  ;;  %vm1547_vm0 = vcmp.eq.f32.partialorder %v1546_v29, 8.507059e+37  ;;  %1629 = vmatpush.msra.mxu0 %v1967_v21  ;;  %v1987_v21 = vld [vmem:[%s2993_s15 + $0x68] sm:$0xff] }
 0xf3d   :  { %1785 = vmatpush.msra.mxu1 %v1987_v21 }
 0xf3e   :  { %v1405_v13 = vadd.f32 %v2797_v42, %v1404_v1  ;;  %1630 = vmatpush.msra.mxu0 %v1966_v49  ;;  %v1986_v49 = vld [vmem:[%s2993_s15 + $0x60] sm:$0xff] }
 0xf3f   :  { %v2155_v3 = vpop.eup %2154  ;;  %1786 = vmatpush.msra.mxu1 %v1986_v49 }
 0xf40   :  { %v1538_v7 = vmul.f32 %v2155_v3, %v2807_v54  ;;  %1953 = vmatmul.msk.f32.gmra.mxu2 %vm275_vm11, %v1279_v2  ;;  %v2046_v36 = vpop.permute.xlu2 %2045  ;;  %vm1543_vm8 = vweird.f32 %v2155_v3  ;;  %v1409_v22 = vsel %vm1408_vm12, %v2797_v42, %v1405_v13 }
 0xf41   :  { %v2047_v11 = vunpack.i.l.bf16 %v2046_v36  ;;  %v2048_v16 = vunpack.i.h.bf16 %v2046_v36  ;;  %vm1544_vm13 = vmor %vm1542_vm9, %vm1543_vm8  ;;  %v1414_v33 = vsel %vm1411_vm15, %v1413_v30, %v1409_v22  ;;  %v2067_v30 = vld [vmem:[%s2988_s11 + $0x1] ss:$0 sm:$0xff] }
 0xf42   :  { %v1539_v12 = vsub.f32 1.0, %v1538_v7  ;;  %v1415_v37 = vmul.f32 %v2755_v41, %v1414_v33 }
 0xf43   :  { %1442 = vmatpush.msrb.mxu3 %v2047_v11  ;;  %v1975_v11 = vld [vmem:[%s2991_s13 + $0x20] sm:$0xff] }
 0xf44   :  { %v1540_v18 = vmul.f32 %v2155_v3, %v1539_v12 }
 0xf45   :  { %1443 = vmatpush.msrb.mxu3 %v2048_v16 }
 0xf46   :  { %1958 = vmatmul.msk.f32.vlgmr.msrb.gmra.mxu3 %vm275_vm11, %v1400_v17  ;;  %v1541_v28 = vadd.f32 %v2155_v3, %v1540_v18 }
 0xf48   :  { %1964 = vmatmul.msk.f32.vlgmr.msrb.gmra.mxu2 %vm275_vm11, %v1536_v9  ;;  %v1545_v24 = vsel %vm1544_vm13, %v2155_v3, %v1541_v28  ;;  %vm1861_vm13 = vcmask 1040384  }
 0xf49   :  { %v1550_v34 = vsel %vm1547_vm0, %v1549_v31, %v1545_v24 }
 0xf4a   :  { %v1551_v35 = vmul.f32 %v2761_v44, %v1550_v34 }
 0xf4e   :  { %1959 = vmatmul.msk.f32.gmra.mxu3 %vm275_vm11, %v1415_v37  ;;  %v2068_v37 = vld [vmem:[%s2989_s12 + $0x1] ss:$0 sm:$0xff] }
 0xf50   :  { %1965 = vmatmul.msk.f32.gmra.mxu2 %vm275_vm11, %v1551_v35 }
 0xfa1   :  { %v1181_v38 = vpop.f32.mrf.mxu3 }
 0xfa2   :  { %1187 = vst.msk [vmem:[#allocation2] sm:$0xff] %vm239_vm10, %v1181_v38 }
 0xfa9   :  { %v1184_v39 = vpop.f32.mrf.mxu3 }
 0xfaa   :  { %1188 = vst.msk [vmem:[#allocation2 + $0x8] sm:$0xff] %vm239_vm10, %v1184_v39 }
 0xfbb   :  { %v1309_v43 = vpop.f32.mrf.mxu2 }
 0xfbc   :  { %1317 = vrot.lane.b32.xlu0 %v1309_v43, %s3037_s4 }
 0xfc3   :  { %v1312_v45 = vpop.f32.mrf.mxu2 }
 0xfc9   :  { %v1445_v46 = vpop.f32.mrf.mxu3 }
 0xfca   :  { %1453 = vrot.lane.b32.xlu1 %v1445_v46, %s3038_s29 }
 0xfcb   :  { %v1581_v41 = vpop.f32.mrf.mxu2 }
 0xfcc   :  { %1589 = vrot.lane.b32.xlu0 %v1581_v41, %s3039_s7 }
 0xfd1   :  { %v1448_v44 = vpop.f32.mrf.mxu3 }
 0xfd2   :  { %1319 = vrot.lane.b32.xlu1 %v1312_v45, %s3037_s4 }
 0xfd3   :  { %v1584_v47 = vpop.f32.mrf.mxu2 }
 0xfd4   :  { %1591 = vrot.lane.b32.xlu2 %v1584_v47, %s3039_s7  ;;  %1455 = vrot.lane.b32.xlu0 %v1448_v44, %s3038_s29 }
0x102e   :  { %v1318_v42 = vpop.permute.xlu0 %1317  ;;  %v1592_v15 = vpop.permute.xlu2 %1591 }
0x102f   :  { %1323 = vst.msk [vmem:[#allocation2] sm:$0xff] %vm495_vm3, %v1318_v42  ;;  %v1985_v42 = vld [vmem:[%s2993_s15 + $0x58] sm:$0xff] }
0x1030   :  { %1787 = vmatpush.msra.mxu1 %v1985_v42 }
0x103c   :  { %v1454_v50 = vpop.permute.xlu1 %1453 }
0x103d   :  { %1459 = vst.msk [vmem:[#allocation2] sm:$0xff] %vm632_vm4, %v1454_v50  ;;  %v1984_v50 = vld [vmem:[%s2993_s15 + $0x50] sm:$0xff] }
0x103e   :  { %v1590_v51 = vpop.permute.xlu0 %1589  ;;  %1788 = vmatpush.msra.mxu1 %v1984_v50 }
0x103f   :  { %1595 = vst.msk [vmem:[#allocation2] sm:$0xff] %vm769_vm5, %v1590_v51  ;;  %v1983_v51 = vld [vmem:[%s2993_s15 + $0x48] sm:$0xff] }
0x1040   :  { %1789 = vmatpush.msra.mxu1 %v1983_v51 }
0x1044   :  { %v1320_v52 = vpop.permute.xlu1 %1319 }
0x1045   :  { %1324 = vst.msk [vmem:[#allocation2 + $0x8] sm:$0xff] %vm495_vm3, %v1320_v52  ;;  %v1982_v52 = vld [vmem:[%s2993_s15 + $0x40] sm:$0xff] }
0x1046   :  { %v1456_v53 = vpop.permute.xlu0 %1455  ;;  %v1597_v54 = vld [vmem:[#allocation2] sm:$0xff]  ;;  %1790 = vmatpush.msra.mxu1 %v1982_v52 }
0x1047   :  { %1460 = vst.msk [vmem:[#allocation2 + $0x8] sm:$0xff] %vm632_vm4, %v1456_v53  ;;  %1971 = vmatmul.msk.f32.vlgmr.msra.gmra.mxu0 %vm132_vm2, %v1597_v54  ;;  %v2069_v53 = vld [vmem:[%s2990_s14 + $0x1] ss:$0 sm:$0xff] }
0x1048   :  { %1596 = vst.msk [vmem:[#allocation2 + $0x8] sm:$0xff] %vm769_vm5, %v1592_v15 }
0x104f   :  { %v1598_v27 = vld [vmem:[#allocation2 + $0x8] sm:$0xff] }
0x1050   :  { %1972 = vmatmul.msk.f32.gmra.mxu0 %vm132_vm2, %v1598_v27 }
0x10c4   :  { %v1632_v56 = vpop.f32.mrf.mxu0 }
0x10c5   :  { %v1633_v25 = vadd.f32 %v2066_v55, %v1632_v56 }
0x10c7   :  { %v1638_v57 = vadd.f32 %v1633_v25, %v2648_v0 }
0x10c9   :  { %v1644_v58 = vsel %vm132_vm2, %v1638_v57, 0.0 }
0x10ca   :  { %1645 = vadd.xlane.f32.xlu1 %v1644_v58 }
0x10cd   :  { %v1635_v59 = vpop.f32.mrf.mxu0 }
0x10ce   :  { %v1636_v60 = vadd.f32 %v2066_v55, %v1635_v59 }
0x10d0   :  { %v1639_v23 = vadd.f32 %v1636_v60, %v2652_v4  ;;  %v1978_v4 = vld [vmem:[%s2991_s13 + $0x38] sm:$0xff] }
0x10d1   :  { %1726 = vmatpush.msra.mxu3 %v1978_v4  ;;  %v2070_v4 = vld [vmem:[%s2992_s16 + $0x1] ss:$0 sm:$0xff] }
0x10d2   :  { %v1647_v61 = vsel %vm132_vm2, %v1639_v23, 0.0 }
0x10d3   :  { %1648 = vadd.xlane.f32.xlu0 %v1647_v61  ;;  %1727 = vmatpush.msra.mxu3 %v1977_v8 }
0x10d5   :  { %1728 = vmatpush.msra.mxu3 %v1976_v10 }
0x10d7   :  { %1729 = vmatpush.msra.mxu3 %v1975_v11 }
0x113d   :  { %v1646_v62 = vpop.xlane.xlu1 %1645 }
0x113e   :  { %v1650_v63 = vmul.f32 %v1646_v62, %v2359_v40 }
0x1140   :  { %v1652_v1 = vsub.f32 %v1638_v57, %v1650_v63 }
0x1142   :  { %v1654_v2 = vmul.f32 %v1652_v1, %v1652_v1 }
0x1144   :  { %v1656_v3 = vsel %vm132_vm2, %v1654_v2, 0.0 }
0x1145   :  { %1657 = vadd.xlane.f32.xlu2 %v1656_v3 }
0x1146   :  { %v1649_v5 = vpop.xlane.xlu0 %1648 }
0x1147   :  { %v1651_v0 = vmul.f32 %v1649_v5, %v2359_v40 }
0x1149   :  { %v1653_v6 = vsub.f32 %v1639_v23, %v1651_v0 }
0x114b   :  { %v1655_v7 = vmul.f32 %v1653_v6, %v1653_v6 }
0x114d   :  { %v1659_v36 = vsel %vm132_vm2, %v1655_v7, 0.0 }
0x114e   :  { %1660 = vadd.xlane.f32.xlu1 %v1659_v36 }
0x11b8   :  { %v1658_v12 = vpop.xlane.xlu2 %1657 }
0x11b9   :  { %v1662_v13 = vmul.f32 %v1658_v12, %v2359_v40 }
0x11bb   :  { %v1664_v26 = vadd.f32 1e-12, %v1662_v13 }
0x11bd   :  { %2156 = vrsqrt.f32 %v1664_v26  ;;  %vm1672_vm11 = vweird.f32 %v1664_v26 }
0x11c1   :  { %v1661_v14 = vpop.xlane.xlu1 %1660 }
0x11c2   :  { %v1663_v16 = vmul.f32 %v1661_v14, %v2359_v40 }
0x11c3   :  { %v2157_v18 = vpop.eup %2156 }
0x11c4   :  { %v1667_v17 = vmul.f32 %v2157_v18, %v1664_v26  ;;  %v1665_v19 = vadd.f32 1e-12, %v1663_v16  ;;  %vm1673_vm10 = vweird.f32 %v2157_v18 }
0x11c5   :  { %vm1674_vm3 = vmor %vm1672_vm11, %vm1673_vm10 }
0x11c6   :  { %v1668_v20 = vmul.f32 %v2157_v18, %v1667_v17  ;;  %2158 = vrsqrt.f32 %v1665_v19  ;;  %vm1682_vm5 = vweird.f32 %v1665_v19 }
0x11c8   :  { %v1669_v9 = vmul.f32 0.5, %v1668_v20 }
0x11ca   :  { %v1670_v22 = vsub.f32 1.5, %v1669_v9 }
0x11cc   :  { %v2159_v28 = vpop.eup %2158  ;;  %v1671_v29 = vmul.f32 %v2157_v18, %v1670_v22 }
0x11cd   :  { %v1677_v24 = vmul.f32 %v2159_v28, %v1665_v19  ;;  %vm1683_vm4 = vweird.f32 %v2159_v28 }
0x11ce   :  { %v1675_v31 = vsel %vm1674_vm3, %v2157_v18, %v1671_v29  ;;  %vm1684_vm1 = vmor %vm1682_vm5, %vm1683_vm4 }
0x11cf   :  { %v1686_v33 = vmul.f32 %v1675_v31, %v1652_v1  ;;  %v1678_v34 = vmul.f32 %v2159_v28, %v1677_v24 }
0x11d1   :  { %v1691_v35 = vmul.f32 %v2067_v30, %v1686_v33  ;;  %v1679_v38 = vmul.f32 0.5, %v1678_v34  ;;  %v1866_v34 = vld [vmem:[%s2997_s19 + $0x18] sm:$0xff] }
0x11d2   :  { %1886 = vmatpush.msra.mxu2 %v1866_v34 }
0x11d3   :  { %v1680_v39 = vsub.f32 1.5, %v1679_v38  ;;  %v1696_v43 = vadd.f32 %v2068_v37, %v1691_v35  ;;  %v1864_v38 = vld [vmem:[%s2997_s19 + $0x8] sm:$0xff] }
0x11d5   :  { %v1681_v45 = vmul.f32 %v2159_v28, %v1680_v39  ;;  %1980 = vmatmul.msk.f32.vlgmr.msra.gmra.mxu3 %vm132_vm2, %v1696_v43  ;;  %v1863_v39 = vld [vmem:[%s2997_s19] sm:$0xff] }
0x11d7   :  { %v1685_v46 = vsel %vm1684_vm1, %v2159_v28, %v1681_v45 }
0x11d8   :  { %v1687_v41 = vmul.f32 %v1685_v46, %v1653_v6 }
0x11da   :  { %v1692_v44 = vmul.f32 %v2067_v30, %v1687_v41 }
0x11dc   :  { %v1697_v47 = vadd.f32 %v2068_v37, %v1692_v44  ;;  %v1865_v37 = vld [vmem:[%s2997_s19 + $0x10] sm:$0xff] }
0x11dd   :  { %1887 = vmatpush.msra.mxu2 %v1865_v37 }
0x11de   :  { %1981 = vmatmul.msk.f32.gmra.mxu3 %vm132_vm2, %v1697_v47 }
0x11df   :  { %1888 = vmatpush.msra.mxu2 %v1864_v38 }
0x11e1   :  { %1889 = vmatpush.msra.mxu2 %v1863_v39 }
0x1258   :  { %v1731_v54 = vpop.f32.mrf.mxu3 }
0x1259   :  { %v1732_v15 = vadd.f32 %v2069_v53, %v1731_v54 }
0x125b   :  { %v1739_v27 = vmul.f32 0.044715, %v1732_v15  ;;  %v1737_v1 = vmul.f32 0.5, %v1732_v15 }
0x125d   :  { %v1741_v55 = vmul.f32 %v1739_v27, %v1732_v15 }
0x125f   :  { %v1743_v56 = vmul.f32 %v1741_v55, %v1732_v15 }
0x1261   :  { %v1745_v25 = vadd.f32 %v1743_v56, %v1732_v15  ;;  %v1734_v57 = vpop.f32.mrf.mxu3 }
0x1262   :  { %v1735_v58 = vadd.f32 %v2069_v53, %v1734_v57  ;;  %v2072_v57 = vld [vmem:[%s2995_s18 + $0x1] ss:$0 sm:$0xff] }
0x1263   :  { %v1747_v59 = vmul.f32 0.7978846, %v1745_v25 }
0x1264   :  { %v1740_v60 = vmul.f32 0.044715, %v1735_v58  ;;  %v1738_v6 = vmul.f32 0.5, %v1735_v58 }
0x1265   :  { %2160 = vtanh.f32 %v1747_v59 }
0x1266   :  { %v1742_v23 = vmul.f32 %v1740_v60, %v1735_v58 }
0x1268   :  { %v1744_v61 = vmul.f32 %v1742_v23, %v1735_v58 }
0x126a   :  { %v1746_v62 = vadd.f32 %v1744_v61, %v1735_v58  ;;  %v2073_v61 = vld [vmem:[%s2996_s20] ss:$0 sm:$0xff] }
0x126b   :  { %v2161_v63 = vpop.eup %2160 }
0x126c   :  { %v1751_v2 = vadd.f32 1.0, %v2161_v63  ;;  %v1748_v3 = vmul.f32 0.7978846, %v1746_v62 }
0x126e   :  { %v1753_v5 = vmul.f32 %v1751_v2, %v1737_v1  ;;  %2162 = vtanh.f32 %v1748_v3 }
0x1270   :  { %1991 = vmatmul.msk.f32.vlgmr.msra.gmra.mxu1 %vm936_vm14, %v1753_v5 }
0x1274   :  { %v2163_v0 = vpop.eup %2162 }
0x1275   :  { %v1752_v7 = vadd.f32 1.0, %v2163_v0 }
0x1277   :  { %v1754_v36 = vmul.f32 %v1752_v7, %v1738_v6 }
0x1279   :  { %1992 = vmatmul.msk.f32.gmra.mxu1 %vm936_vm14, %v1754_v36 }
0x12ed   :  { %v1792_v8 = vpop.f32.mrf.mxu1 }
0x12ee   :  { %v1793_v10 = vadd.f32 %v2070_v4, %v1792_v8 }
0x12f0   :  { %v1798_v11 = vadd.f32 %v1793_v10, %v1696_v43 }
0x12f2   :  { %v1804_v12 = vsel %vm132_vm2, %v1798_v11, 0.0 }
0x12f3   :  { %1805 = vadd.xlane.f32.xlu2 %v1804_v12 }
0x12f6   :  { %v1795_v13 = vpop.f32.mrf.mxu1 }
0x12f7   :  { %v1796_v26 = vadd.f32 %v2070_v4, %v1795_v13 }
0x12f9   :  { %v1799_v14 = vadd.f32 %v1796_v26, %v1697_v47 }
0x12fb   :  { %v1807_v16 = vsel %vm132_vm2, %v1799_v14, 0.0 }
0x12fc   :  { %1808 = vadd.xlane.f32.xlu0 %v1807_v16 }
0x1366   :  { %v1806_v18 = vpop.xlane.xlu2 %1805 }
0x1367   :  { %v1810_v17 = vmul.f32 %v1806_v18, %v2359_v40 }
0x1369   :  { %v1812_v19 = vsub.f32 %v1798_v11, %v1810_v17 }
0x136b   :  { %v1814_v20 = vmul.f32 %v1812_v19, %v1812_v19 }
0x136d   :  { %v1816_v9 = vsel %vm132_vm2, %v1814_v20, 0.0 }
0x136e   :  { %1817 = vadd.xlane.f32.xlu0 %v1816_v9 }
0x136f   :  { %v1809_v22 = vpop.xlane.xlu0 %1808 }
0x1370   :  { %v1811_v28 = vmul.f32 %v1809_v22, %v2359_v40 }
0x1372   :  { %v1813_v29 = vsub.f32 %v1799_v14, %v1811_v28 }
0x1374   :  { %v1815_v30 = vmul.f32 %v1813_v29, %v1813_v29 }
0x1376   :  { %v1819_v24 = vsel %vm132_vm2, %v1815_v30, 0.0 }
0x1377   :  { %1820 = vadd.xlane.f32.xlu1 %v1819_v24 }
0x13e1   :  { %v1818_v31 = vpop.xlane.xlu0 %1817 }
0x13e2   :  { %v1822_v33 = vmul.f32 %v1818_v31, %v2359_v40 }
0x13e4   :  { %v1824_v35 = vadd.f32 1e-12, %v1822_v33 }
0x13e6   :  { %2164 = vrsqrt.f32 %v1824_v35  ;;  %vm1832_vm6 = vweird.f32 %v1824_v35 }
0x13ea   :  { %v1821_v43 = vpop.xlane.xlu1 %1820 }
0x13eb   :  { %v1823_v45 = vmul.f32 %v1821_v43, %v2359_v40  ;;  %v2071_v40 = vld [vmem:[%s2994_s17 + $0x1] ss:$0 sm:$0xff] }
0x13ec   :  { %v2165_v46 = vpop.eup %2164 }
0x13ed   :  { %v1827_v41 = vmul.f32 %v2165_v46, %v1824_v35  ;;  %v1825_v44 = vadd.f32 1e-12, %v1823_v45  ;;  %vm1833_vm14 = vweird.f32 %v2165_v46 }
0x13ee   :  { %vm1834_vm7 = vmor %vm1832_vm6, %vm1833_vm14 }
0x13ef   :  { %v1828_v47 = vmul.f32 %v2165_v46, %v1827_v41  ;;  %2166 = vrsqrt.f32 %v1825_v44  ;;  %vm1842_vm9 = vweird.f32 %v1825_v44 }
0x13f1   :  { %v1829_v32 = vmul.f32 0.5, %v1828_v47 }
0x13f3   :  { %v1830_v48 = vsub.f32 1.5, %v1829_v32 }
0x13f5   :  { %v2167_v21 = vpop.eup %2166  ;;  %v1831_v42 = vmul.f32 %v2165_v46, %v1830_v48 }
0x13f6   :  { %v1837_v49 = vmul.f32 %v2167_v21, %v1825_v44  ;;  %vm1843_vm8 = vweird.f32 %v2167_v21 }
0x13f7   :  { %v1835_v52 = vsel %vm1834_vm7, %v2165_v46, %v1831_v42  ;;  %vm1844_vm12 = vmor %vm1842_vm9, %vm1843_vm8 }
0x13f8   :  { %v1838_v50 = vmul.f32 %v2167_v21, %v1837_v49  ;;  %v1846_v15 = vmul.f32 %v1835_v52, %v1812_v19 }
0x13fa   :  { %v1839_v51 = vmul.f32 0.5, %v1838_v50  ;;  %v1851_v56 = vmul.f32 %v2071_v40, %v1846_v15 }
0x13fc   :  { %v1840_v53 = vsub.f32 1.5, %v1839_v51  ;;  %v1856_v59 = vadd.f32 %v2072_v57, %v1851_v56 }
0x13fe   :  { %v1841_v54 = vmul.f32 %v2167_v21, %v1840_v53 }
0x1400   :  { %v1845_v27 = vsel %vm1844_vm12, %v2167_v21, %v1841_v54 }
0x1401   :  { %v1847_v55 = vmul.f32 %v1845_v27, %v1813_v29 }
0x1403   :  { %v1852_v25 = vmul.f32 %v2071_v40, %v1847_v55 }
0x1405   :  { %v1857_v58 = vadd.f32 %v2072_v57, %v1852_v25 }
0x1407   :  { %v1859_v60 = vrot.slane %v1857_v58, 7 }
0x1409   :  { %v1862_v23 = vsel %vm1861_vm13, %v1856_v59, %v1859_v60 }
0x140a   :  { %1995 = vmatmul.msk.f32.vlgmr.msra.gmra.mxu2 %vm132_vm2, %v1862_v23 }
0x148d   :  { %v1891_v62 = vpop.f32.mrf.mxu2 }
0x148e   :  { %v1892_v63 = vadd.f32 %v2073_v61, %v1891_v62 }
0x1490   :  { %1894 = vst [vmem:[%s2998_s21] sm:$0x3] %v1892_v63 }

</bundles_post_ra>
